<compile_context>
chip_gen: v6e
topology: v6e:2x2x1
jax: 0.10.0
libtpu: 0.0.40
codegen_flags: <defaults>
</compile_context>

<pallas_src>
import functools
from dataclasses import dataclass
from typing import List

import jax
import jax.numpy as jnp
from jax import lax
from jax.experimental import pallas as pl
from jax.experimental.pallas import tpu as pltpu


# ----------------------------- model hyper-params -----------------------------
NUM_USERS = 10
NUM_ITEMS = 20
EMBEDDING_DIM = 32                                # D
TEXT_DIM = 64
IMAGE_DIM = 48
NUM_NEG = 3                                       # items per row = 1 + NUM_NEG
NUM_FACTORS = 4                                   # F
FACTOR_SIZE = EMBEDDING_DIM // NUM_FACTORS        # 8
NUM_MODALITIES = 3                                # M (rating + text + image)
HIDDEN = 150                                      # torch Linear hidden width
HIDDEN_PAD = 384                                  # 150 + 150 packed, padded to 384
BATCH = 2

TR_TARGET = 2048                                  # row-tile / pipelining unit
EPS2 = 1e-24                                      # (1e-12)^2, torch F.normalize eps


@dataclass
class EmbeddingFactorLists:
    user_embedding_factors: List[jnp.ndarray]
    item_embedding_factors: List[jnp.ndarray]
    text_embedding_factors: List[jnp.ndarray] = None
    image_embedding_factors: List[jnp.ndarray] = None


# ------------------------------- small helpers --------------------------------
def _leaky_relu(x, slope=0.01):
    return jnp.where(x > 0, x, slope * x)


def _softplus(x):
    # numerically stable log(1 + exp(x))
    return jnp.maximum(x, 0.0) + jnp.log(1.0 + jnp.exp(-jnp.abs(x)))


def _l2_normalize(x, axis=-1):
    ss = jnp.sum(x * x, axis=axis, keepdims=True)
    return x * lax.rsqrt(jnp.maximum(ss, EPS2))


def _round_up(x, m):
    return ((x + m - 1) // m) * m


# --------------------------------- the kernel ---------------------------------
def dmrl_kernel(ui_ref, t_ref, im_ref,
                w1t_ref, w1i_ref, b1f_ref, w2f_ref, b2f_ref,
                s128_ref, ba_ref, e412_ref, ba1_ref, w2b_ref, gsum_ref,
                s32_ref, pq_ref, ones_f_ref,
                out_ref, *, d, nf):
    f32 = jnp.float32
    bf16 = jnp.bfloat16

    # ---- per-modality L2 normalise of the raw text / image features ----------
    t = t_ref[...].astype(f32)                                       # (TR, 64)
    im = im_ref[...].astype(f32)                                     # (TR, 48)
    t_n = t * lax.rsqrt(jnp.maximum(jnp.sum(t * t, -1, keepdims=True), EPS2))
    im_n = im * lax.rsqrt(jnp.maximum(jnp.sum(im * im, -1, keepdims=True), EPS2))

    # ---- fused text + image towers (hidden packed 150+150, padded to 384) ----
    h = (jnp.dot(t_n.astype(bf16), w1t_ref[...], preferred_element_type=f32)
         + jnp.dot(im_n.astype(bf16), w1i_ref[...], preferred_element_type=f32))
    h = _leaky_relu(h + b1f_ref[...])                                # (TR, 384)
    teie = jnp.dot(h.astype(bf16), w2f_ref[...], preferred_element_type=f32)
    teie = _leaky_relu(teie + b2f_ref[...])                          # (TR, 64) = [te | ie]

    ui = ui_ref[...].astype(f32)                                     # (TR, 64) = [u | it]
    catx = jnp.concatenate([ui, teie], axis=-1)                      # (TR, 128) = [u|it|te|ie]

    # ---- factor-batched concat-normalise + attention MLP (block matmuls) -----
    sumsq = jnp.dot(catx * catx, s128_ref[...], preferred_element_type=f32)   # (TR, F)
    inv = lax.rsqrt(jnp.maximum(sumsq, EPS2))
    inv12 = jnp.dot(inv, e412_ref[...], preferred_element_type=f32)           # (TR, F*M)
    zraw = jnp.dot(catx, ba_ref[...], preferred_element_type=f32)             # (TR, F*M)
    a1 = jnp.tanh(zraw * inv12 + ba1_ref[...])
    logits = jnp.dot(a1, w2b_ref[...], preferred_element_type=f32)            # (TR, F*M)
    # row-wise max is shift-invariant for the per-3-column-group softmax; the
    # tanh-bounded logits keep all groups within a few units of the global max.
    logits = logits - jnp.max(logits, axis=-1, keepdims=True)
    ex = jnp.exp(logits)
    denom = jnp.dot(ex, gsum_ref[...], preferred_element_type=f32)
    att = ex / denom                            # exact reciprocal (review note)

    # ---- per-factor <u,item>/<u,text>/<u,image> dot products on the MXU ------
    u, it = ui[:, 0:d], ui[:, d:2 * d]
    te, ie = teie[:, 0:d], teie[:, d:2 * d]
    s32 = s32_ref[...]
    d_ui = jnp.dot(u * it, s32, preferred_element_type=f32)          # (TR, F)
    d_ut = jnp.dot(u * te, s32, preferred_element_type=f32)
    d_um = jnp.dot(u * ie, s32, preferred_element_type=f32)

    attp = jnp.dot(att, pq_ref[...], preferred_element_type=f32)     # (TR, 2F)
    att_ui, att_tm = attp[:, 0:nf], attp[:, nf:2 * nf]
    # (reference module reuses attention column 1 for the image modality)
    r = att_ui * _softplus(d_ui) + att_tm * (_softplus(d_ut) + _softplus(d_um))

    # ---- reduce over factors + replicate -> one dense 128-lane bf16 store ----
    rat = jnp.dot(r, ones_f_ref[...], preferred_element_type=f32)    # (TR, 64)
    out_ref[...] = jnp.concatenate([teie, rat], axis=-1).astype(out_ref.dtype)


# --------------------------- kernel parameter packing ---------------------------
def _prep_kernel_params(params):
    f32, bf16 = jnp.float32, jnp.bfloat16
    D, FS, F, M = EMBEDDING_DIM, FACTOR_SIZE, NUM_FACTORS, NUM_MODALITIES
    H, HP = HIDDEN, HIDDEN_PAD

    # towers: text hidden units in cols [0:150), image hidden units in [150:300)
    w1t = jnp.zeros((TEXT_DIM, HP), f32).at[:, 0:H].set(params["wt1"])
    w1i = jnp.zeros((IMAGE_DIM, HP), f32).at[:, H:2 * H].set(params["wi1"])
    b1f = (jnp.zeros((1, HP), f32)
           .at[:, 0:H].set(params["bt1"])
           .at[:, H:2 * H].set(params["bi1"]))
    w2f = (jnp.zeros((HP, 2 * D), f32)
           .at[0:H, 0:D].set(params["wt2"])
           .at[H:2 * H, D:2 * D].set(params["wi2"]))
    b2f = jnp.concatenate([params["bt2"], params["bi2"]], axis=-1)

    wa1, ba1, wa2 = params["wa1"], params["ba1"], params["wa2"]

    # catx lane layout: [u 0:32 | it 32:64 | te 64:96 | ie 96:128]
    s128 = jnp.zeros((4 * D, F), f32)       # sum-of-squares indicator
    ba = jnp.zeros((4 * D, F * M), f32)     # block attention-L1 weights
    e412 = jnp.zeros((F, F * M), f32)       # expand per-factor scalar -> 3 cols
    w2b = jnp.zeros((F * M, F * M), f32)    # block-diag attention-L2 weights
    gsum = jnp.zeros((F * M, F * M), f32)   # per-group softmax denominator
    s32 = jnp.zeros((D, F), f32)            # per-factor dot-product indicator
    pq = jnp.zeros((F * M, 2 * F), f32)     # fused attention-column projection
    for f in range(F):
        r0 = f * FS
        c0 = f * M
        for p in range(4):                  # p-th part of the concat: u, it, te, ie
            lane0 = p * D + r0
            s128 = s128.at[lane0:lane0 + FS, f].set(1.0)
            ba = ba.at[lane0:lane0 + FS, c0:c0 + M].set(wa1[p * FS:(p + 1) * FS, :])
        e412 = e412.at[f, c0:c0 + M].set(1.0)
        w2b = w2b.at[c0:c0 + M, c0:c0 + M].set(wa2)
        gsum = gsum.at[c0:c0 + M, c0:c0 + M].set(1.0)
        s32 = s32.at[r0:r0 + FS, f].set(1.0)
        pq = pq.at[c0, f].set(1.0)          # attention col 3f   -> att_ui[f]
        pq = pq.at[c0 + 1, F + f].set(1.0)  # attention col 3f+1 -> att_tm[f]

    ba1_t = jnp.tile(ba1, (1, F))                          # (1, F*M)
    ones_f = jnp.ones((F, 2 * D), f32)                     # reduce-over-factors + replicate

    return [w1t.astype(bf16), w1i.astype(bf16), b1f, w2f.astype(bf16), b2f,
            s128, ba, e412, ba1_t, w2b, gsum, s32, pq, ones_f]


# --------------------------------- the wrapper ---------------------------------
def dmrl_forward(params, batch, text, image):
    """batch: (B, 1+N) int32; text: (B, N, TEXT_DIM); image: (B, N, IMAGE_DIM)."""
    B = batch.shape[0]
    N = batch.shape[1] - 1
    D = EMBEDDING_DIM
    R = B * N

    users = batch[:, 0]
    items = batch[:, 1:]
    user_emb = params["user_embedding"][users]                       # (B, D)
    user_inf = jnp.broadcast_to(user_emb[:, None, :], (B, N, D))     # (B, N, D)
    item_emb = params["item_embedding"][items]                       # (B, N, D)

    # row layout: [user(32) | item(32)] in bf16 (halves kernel-side input DMA).
    ui = jnp.concatenate([user_inf.reshape(R, D), item_emb.reshape(R, D)],
                         axis=-1).astype(jnp.bfloat16)               # (R, 64)
    text_r = text.reshape(R, TEXT_DIM).astype(jnp.bfloat16)          # (R, 64)
    image_r = image.reshape(R, IMAGE_DIM).astype(jnp.bfloat16)       # (R, 48)

    # Tiling: an even number of grid steps >= 2 (so both v7x TensorCores get
    # balanced work), TR capped at TR_TARGET and rounded to 16 (bf16 sublane
    # packing).  Padded rows stay finite and are sliced off below.
    steps = -(-R // TR_TARGET)
    steps = max(2, 2 * ((steps + 1) // 2))
    TR = _round_up(-(-R // steps), 16)
    R_pad = steps * TR
    if R_pad != R:
        pad = ((0, R_pad - R), (0, 0))
        ui = jnp.pad(ui, pad)
        text_r = jnp.pad(text_r, pad)
        image_r = jnp.pad(image_r, pad)

    weights = _prep_kernel_params(params)

    in_specs = ([pl.BlockSpec((TR, 2 * D), lambda i: (i, 0)),
                 pl.BlockSpec((TR, TEXT_DIM), lambda i: (i, 0)),
                 pl.BlockSpec((TR, IMAGE_DIM), lambda i: (i, 0))]
                + [pl.BlockSpec(w.shape, lambda i: (0, 0)) for w in weights])
    out_spec = pl.BlockSpec((TR, 4 * D), lambda i: (i, 0))

    slab = pl.pallas_call(
        functools.partial(dmrl_kernel, d=D, nf=NUM_FACTORS),
        grid=(steps,),
        in_specs=in_specs,
        out_specs=out_spec,
        out_shape=jax.ShapeDtypeStruct((R_pad, 4 * D), jnp.bfloat16),
        compiler_params=pltpu.CompilerParams(
            dimension_semantics=("parallel",),
            vmem_limit_bytes=48 * 1024 * 1024),
    )(ui, text_r, image_r, *weights)

    teie = slab[:R, 0:2 * D].astype(jnp.float32)   # [text_emb | image_emb]
    ratings = slab[:R, 2 * D].astype(jnp.float32)  # rating replicated in lanes 64..127
    text_embedding = teie[:, 0:D].reshape(B, N, D)
    image_embedding = teie[:, D:2 * D].reshape(B, N, D)
    ratings_sum_over_mods = ratings.reshape(B, N)

    split = lambda x: list(jnp.split(x, NUM_FACTORS, axis=-1))
    efl = EmbeddingFactorLists(
        user_embedding_factors=split(user_inf),
        item_embedding_factors=split(item_emb),
        text_embedding_factors=split(text_embedding),
        image_embedding_factors=split(image_embedding),
    )
    return efl, ratings_sum_over_mods


# --------------------------- pure-JAX reference check ---------------------------
def _reference(params, batch, text, image):
    B = batch.shape[0]
    N = batch.shape[1] - 1
    D, FS = EMBEDDING_DIM, FACTOR_SIZE
    R = B * N
    f32, bf16 = jnp.float32, jnp.bfloat16

    users = batch[:, 0]
    items = batch[:, 1:]
    u = jnp.broadcast_to(params["user_embedding"][users][:, None, :],
                         (B, N, D)).reshape(R, D)
    it = params["item_embedding"][items].reshape(R, D)

    def tower(x, w1, b1, w2, b2):
        xn = _l2_normalize(x)
        h = _leaky_relu(jnp.dot(xn.astype(bf16), w1.astype(bf16),
                                preferred_element_type=f32) + b1)
        return _leaky_relu(jnp.dot(h.astype(bf16), w2.astype(bf16),
                                   preferred_element_type=f32) + b2)

    te = tower(text.reshape(R, TEXT_DIM).astype(f32), params["wt1"], params["bt1"],
               params["wt2"], params["bt2"])
    ie = tower(image.reshape(R, IMAGE_DIM).astype(f32), params["wi1"], params["bi1"],
               params["wi2"], params["bi2"])

    ratings = jnp.zeros((R,), f32)
    for f in range(NUM_FACTORS):
        sl = slice(f * FS, (f + 1) * FS)
        uf, itf, tf_, imf = u[:, sl], it[:, sl], te[:, sl], ie[:, sl]
        cat = _l2_normalize(jnp.concatenate([uf, itf, tf_, imf], axis=-1))
        a1 = jnp.tanh(cat @ params["wa1"] + params["ba1"])
        att = jax.nn.softmax(a1 @ params["wa2"], axis=-1)
        ratings = ratings + att[:, 0] * jax.nn.softplus(jnp.sum(uf * itf, -1))
        ratings = ratings + att[:, 1] * jax.nn.softplus(jnp.sum(uf * tf_, -1))
        # reference module reuses attention column 1 for the image modality
        ratings = ratings + att[:, 1] * jax.nn.softplus(jnp.sum(uf * imf, -1))
    return te.reshape(B, N, D), ie.reshape(B, N, D), ratings.reshape(B, N)


# ------------------------------------ main ------------------------------------
def _xavier_normal(key, shape):
    fan_in, fan_out = shape[0], shape[-1]
    std = (2.0 / (fan_in + fan_out)) ** 0.5
    return std * jax.random.normal(key, shape, dtype=jnp.float32)


if __name__ == "__main__":
    key = jax.random.PRNGKey(0)
    ks = jax.random.split(key, 16)

    # Parameters: weights stored transposed to (in, out); biases as (1, out).
    params = {
        "user_embedding": _xavier_normal(ks[0], (NUM_USERS, EMBEDDING_DIM)),
        "item_embedding": _xavier_normal(ks[1], (NUM_ITEMS, EMBEDDING_DIM)),
        "wt1": _xavier_normal(ks[2], (TEXT_DIM, HIDDEN)),
        "bt1": 0.01 * jax.random.normal(ks[3], (1, HIDDEN), dtype=jnp.float32),
        "wt2": _xavier_normal(ks[4], (HIDDEN, EMBEDDING_DIM)),
        "bt2": 0.01 * jax.random.normal(ks[5], (1, EMBEDDING_DIM), dtype=jnp.float32),
        "wi1": _xavier_normal(ks[6], (IMAGE_DIM, HIDDEN)),
        "bi1": 0.01 * jax.random.normal(ks[7], (1, HIDDEN), dtype=jnp.float32),
        "wi2": _xavier_normal(ks[8], (HIDDEN, EMBEDDING_DIM)),
        "bi2": 0.01 * jax.random.normal(ks[9], (1, EMBEDDING_DIM), dtype=jnp.float32),
        "wa1": _xavier_normal(ks[10], ((NUM_MODALITIES + 1) * FACTOR_SIZE, NUM_MODALITIES)),
        "ba1": 0.01 * jax.random.normal(ks[11], (1, NUM_MODALITIES), dtype=jnp.float32),
        "wa2": _xavier_normal(ks[12], (NUM_MODALITIES, NUM_MODALITIES)),
    }

    # Inputs: batch = [user_idx, pos_item, neg_item * NUM_NEG]; the encoded
    # text/image features are supplied in bf16 (the kernel's native input dtype).
    N = 1 + NUM_NEG
    user_col = jax.random.randint(ks[13], (BATCH, 1), 0, NUM_USERS)
    item_cols = jax.random.randint(ks[14], (BATCH, N), 0, NUM_ITEMS)
    batch = jnp.concatenate([user_col, item_cols], axis=1).astype(jnp.int32)
    text = jax.random.normal(ks[15], (BATCH, N, TEXT_DIM),
                             dtype=jnp.float32).astype(jnp.bfloat16)
    image = jax.random.normal(jax.random.fold_in(key, 99), (BATCH, N, IMAGE_DIM),
                              dtype=jnp.float32).astype(jnp.bfloat16)

    efl, ratings = dmrl_forward(params, batch, text, image)
    jax.block_until_ready(ratings)

    assert ratings.shape == (BATCH, N)
    assert len(efl.user_embedding_factors) == NUM_FACTORS
    assert efl.text_embedding_factors[0].shape == (BATCH, N, FACTOR_SIZE)

    te_ref, ie_ref, r_ref = _reference(params, batch, text, image)
    te_k = jnp.concatenate(efl.text_embedding_factors, axis=-1)
    ie_k = jnp.concatenate(efl.image_embedding_factors, axis=-1)
    # 2e-2 tolerance: kernel runs bf16 I/O + bf16 MXU operands end to end.
    assert jnp.allclose(te_k, te_ref, rtol=2e-2, atol=2e-2)
    assert jnp.allclose(ie_k, ie_ref, rtol=2e-2, atol=2e-2)
    assert jnp.allclose(ratings, r_ref, rtol=2e-2, atol=2e-2), (ratings, r_ref)

    print("KERNEL_OK")
</pallas_src>

<mosaic_0001>
module attributes {stable_mosaic.version = 11 : i64} {
  func.func @dmrl_kernel(%arg0: i32, %arg1: memref<16x64xbf16, #tpu.memory_space<vmem>>, %arg2: memref<16x64xbf16, #tpu.memory_space<vmem>>, %arg3: memref<16x48xbf16, #tpu.memory_space<vmem>>, %arg4: memref<64x384xbf16, #tpu.memory_space<vmem>>, %arg5: memref<48x384xbf16, #tpu.memory_space<vmem>>, %arg6: memref<1x384xf32, #tpu.memory_space<vmem>>, %arg7: memref<384x64xbf16, #tpu.memory_space<vmem>>, %arg8: memref<1x64xf32, #tpu.memory_space<vmem>>, %arg9: memref<128x4xf32, #tpu.memory_space<vmem>>, %arg10: memref<128x12xf32, #tpu.memory_space<vmem>>, %arg11: memref<4x12xf32, #tpu.memory_space<vmem>>, %arg12: memref<1x12xf32, #tpu.memory_space<vmem>>, %arg13: memref<12x12xf32, #tpu.memory_space<vmem>>, %arg14: memref<12x12xf32, #tpu.memory_space<vmem>>, %arg15: memref<32x4xf32, #tpu.memory_space<vmem>>, %arg16: memref<12x8xf32, #tpu.memory_space<vmem>>, %arg17: memref<4x64xf32, #tpu.memory_space<vmem>>, %arg18: memref<16x128xbf16, #tpu.memory_space<vmem>>) attributes {dimension_semantics = [#tpu.dimension_semantics<parallel>], iteration_bounds = array<i64: 2>, scalar_prefetch = 0 : i64, scratch_operands = 0 : i64, tpu.core_type = #tpu.core_type<tc>, window_params = [{transform_indices = @transform_0, window_bounds = array<i64: 16, 64>}, {transform_indices = @transform_1, window_bounds = array<i64: 16, 64>}, {transform_indices = @transform_2, window_bounds = array<i64: 16, 48>}, {pipeline_mode = #tpu.pipeline_mode<synchronous>, transform_indices = @transform_3, window_bounds = array<i64: 64, 384>}, {pipeline_mode = #tpu.pipeline_mode<synchronous>, transform_indices = @transform_4, window_bounds = array<i64: 48, 384>}, {pipeline_mode = #tpu.pipeline_mode<synchronous>, transform_indices = @transform_5, window_bounds = array<i64: 1, 384>}, {pipeline_mode = #tpu.pipeline_mode<synchronous>, transform_indices = @transform_6, window_bounds = array<i64: 384, 64>}, {pipeline_mode = #tpu.pipeline_mode<synchronous>, transform_indices = @transform_7, window_bounds = array<i64: 1, 64>}, {pipeline_mode = #tpu.pipeline_mode<synchronous>, transform_indices = @transform_8, window_bounds = array<i64: 128, 4>}, {pipeline_mode = #tpu.pipeline_mode<synchronous>, transform_indices = @transform_9, window_bounds = array<i64: 128, 12>}, {pipeline_mode = #tpu.pipeline_mode<synchronous>, transform_indices = @transform_10, window_bounds = array<i64: 4, 12>}, {pipeline_mode = #tpu.pipeline_mode<synchronous>, transform_indices = @transform_11, window_bounds = array<i64: 1, 12>}, {pipeline_mode = #tpu.pipeline_mode<synchronous>, transform_indices = @transform_12, window_bounds = array<i64: 12, 12>}, {pipeline_mode = #tpu.pipeline_mode<synchronous>, transform_indices = @transform_13, window_bounds = array<i64: 12, 12>}, {pipeline_mode = #tpu.pipeline_mode<synchronous>, transform_indices = @transform_14, window_bounds = array<i64: 32, 4>}, {pipeline_mode = #tpu.pipeline_mode<synchronous>, transform_indices = @transform_15, window_bounds = array<i64: 12, 8>}, {pipeline_mode = #tpu.pipeline_mode<synchronous>, transform_indices = @transform_16, window_bounds = array<i64: 4, 64>}, {transform_indices = @transform_17, window_bounds = array<i64: 16, 128>}]} {
    %c0 = arith.constant 0 : index
    %c0_0 = arith.constant 0 : index
    %0 = vector.load %arg2[%c0, %c0_0] : memref<16x64xbf16, #tpu.memory_space<vmem>>, vector<16x64xbf16>
    %1 = arith.extf %0 : vector<16x64xbf16> to vector<16x64xf32>
    %c0_1 = arith.constant 0 : index
    %c0_2 = arith.constant 0 : index
    %2 = vector.load %arg3[%c0_1, %c0_2] : memref<16x48xbf16, #tpu.memory_space<vmem>>, vector<16x48xbf16>
    %3 = arith.extf %2 : vector<16x48xbf16> to vector<16x48xf32>
    %4 = arith.mulf %1, %1 : vector<16x64xf32>
    %cst = arith.constant dense<0.000000e+00> : vector<16xf32>
    %5 = vector.multi_reduction <add>, %4, %cst [1] : vector<16x64xf32> to vector<16xf32>
    %6 = vector.shape_cast %5 : vector<16xf32> to vector<16x1xf32>
    %cst_3 = arith.constant 1.000000e-24 : f32
    %7 = vector.broadcast %cst_3 : f32 to vector<16x1xf32>
    %8 = arith.maximumf %6, %7 : vector<16x1xf32>
    %9 = math.rsqrt %8 : vector<16x1xf32>
    %10 = vector.broadcast %9 : vector<16x1xf32> to vector<16x64xf32>
    %11 = arith.mulf %1, %10 : vector<16x64xf32>
    %12 = arith.mulf %3, %3 : vector<16x48xf32>
    %cst_4 = arith.constant dense<0.000000e+00> : vector<16xf32>
    %13 = vector.multi_reduction <add>, %12, %cst_4 [1] : vector<16x48xf32> to vector<16xf32>
    %14 = vector.shape_cast %13 : vector<16xf32> to vector<16x1xf32>
    %cst_5 = arith.constant 1.000000e-24 : f32
    %15 = vector.broadcast %cst_5 : f32 to vector<16x1xf32>
    %16 = arith.maximumf %14, %15 : vector<16x1xf32>
    %17 = math.rsqrt %16 : vector<16x1xf32>
    %18 = vector.broadcast %17 : vector<16x1xf32> to vector<16x48xf32>
    %19 = arith.mulf %3, %18 : vector<16x48xf32>
    %20 = arith.truncf %11 : vector<16x64xf32> to vector<16x64xbf16>
    %c0_6 = arith.constant 0 : index
    %c0_7 = arith.constant 0 : index
    %21 = vector.load %arg4[%c0_6, %c0_7] : memref<64x384xbf16, #tpu.memory_space<vmem>>, vector<64x384xbf16>
    %cst_8 = arith.constant dense<0.000000e+00> : vector<16x384xf32>
    %22 = tpu.matmul %20, %21, %cst_8 {dimension_numbers = #tpu.dot_dimension_numbers<[1], [0], [0], [1], [0, 0, 1, 1], [], []>} : vector<16x64xbf16>, vector<64x384xbf16>, vector<16x384xf32> -> vector<16x384xf32>
    %23 = arith.truncf %19 : vector<16x48xf32> to vector<16x48xbf16>
    %c0_9 = arith.constant 0 : index
    %c0_10 = arith.constant 0 : index
    %24 = vector.load %arg5[%c0_9, %c0_10] : memref<48x384xbf16, #tpu.memory_space<vmem>>, vector<48x384xbf16>
    %cst_11 = arith.constant dense<0.000000e+00> : vector<16x384xf32>
    %25 = tpu.matmul %23, %24, %cst_11 {dimension_numbers = #tpu.dot_dimension_numbers<[1], [0], [0], [1], [0, 0, 1, 1], [], []>} : vector<16x48xbf16>, vector<48x384xbf16>, vector<16x384xf32> -> vector<16x384xf32>
    %26 = arith.addf %22, %25 : vector<16x384xf32>
    %c0_12 = arith.constant 0 : index
    %c0_13 = arith.constant 0 : index
    %27 = vector.load %arg6[%c0_12, %c0_13] : memref<1x384xf32, #tpu.memory_space<vmem>>, vector<1x384xf32>
    %28 = vector.broadcast %27 : vector<1x384xf32> to vector<16x384xf32>
    %29 = arith.addf %26, %28 : vector<16x384xf32>
    %cst_14 = arith.constant 0.000000e+00 : f32
    %30 = vector.broadcast %cst_14 : f32 to vector<16x384xf32>
    %31 = arith.cmpf ogt, %29, %30 : vector<16x384xf32>
    %cst_15 = arith.constant 0.00999999977 : f32
    %32 = vector.broadcast %cst_15 : f32 to vector<16x384xf32>
    %33 = arith.mulf %32, %29 : vector<16x384xf32>
    %34 = arith.select %31, %29, %33 : vector<16x384xi1>, vector<16x384xf32>
    %35 = arith.truncf %34 : vector<16x384xf32> to vector<16x384xbf16>
    %c0_16 = arith.constant 0 : index
    %c0_17 = arith.constant 0 : index
    %36 = vector.load %arg7[%c0_16, %c0_17] : memref<384x64xbf16, #tpu.memory_space<vmem>>, vector<384x64xbf16>
    %cst_18 = arith.constant dense<0.000000e+00> : vector<16x64xf32>
    %37 = tpu.matmul %35, %36, %cst_18 {dimension_numbers = #tpu.dot_dimension_numbers<[1], [0], [0], [1], [0, 0, 1, 1], [], []>} : vector<16x384xbf16>, vector<384x64xbf16>, vector<16x64xf32> -> vector<16x64xf32>
    %c0_19 = arith.constant 0 : index
    %c0_20 = arith.constant 0 : index
    %38 = vector.load %arg8[%c0_19, %c0_20] : memref<1x64xf32, #tpu.memory_space<vmem>>, vector<1x64xf32>
    %39 = vector.broadcast %38 : vector<1x64xf32> to vector<16x64xf32>
    %40 = arith.addf %37, %39 : vector<16x64xf32>
    %cst_21 = arith.constant 0.000000e+00 : f32
    %41 = vector.broadcast %cst_21 : f32 to vector<16x64xf32>
    %42 = arith.cmpf ogt, %40, %41 : vector<16x64xf32>
    %cst_22 = arith.constant 0.00999999977 : f32
    %43 = vector.broadcast %cst_22 : f32 to vector<16x64xf32>
    %44 = arith.mulf %43, %40 : vector<16x64xf32>
    %45 = arith.select %42, %40, %44 : vector<16x64xi1>, vector<16x64xf32>
    %c0_23 = arith.constant 0 : index
    %c0_24 = arith.constant 0 : index
    %46 = vector.load %arg1[%c0_23, %c0_24] : memref<16x64xbf16, #tpu.memory_space<vmem>>, vector<16x64xbf16>
    %47 = arith.extf %46 : vector<16x64xbf16> to vector<16x64xf32>
    %48 = tpu.concatenate %47, %45 in 1 : vector<16x64xf32>, vector<16x64xf32> -> vector<16x128xf32>
    %49 = arith.mulf %48, %48 : vector<16x128xf32>
    %c0_25 = arith.constant 0 : index
    %c0_26 = arith.constant 0 : index
    %50 = vector.load %arg9[%c0_25, %c0_26] : memref<128x4xf32, #tpu.memory_space<vmem>>, vector<128x4xf32>
    %cst_27 = arith.constant dense<0.000000e+00> : vector<16x4xf32>
    %51 = tpu.matmul %49, %50, %cst_27 {dimension_numbers = #tpu.dot_dimension_numbers<[1], [0], [0], [1], [0, 0, 1, 1], [], []>} : vector<16x128xf32>, vector<128x4xf32>, vector<16x4xf32> -> vector<16x4xf32>
    %cst_28 = arith.constant 1.000000e-24 : f32
    %52 = vector.broadcast %cst_28 : f32 to vector<16x4xf32>
    %53 = arith.maximumf %51, %52 : vector<16x4xf32>
    %54 = math.rsqrt %53 : vector<16x4xf32>
    %c0_29 = arith.constant 0 : index
    %c0_30 = arith.constant 0 : index
    %55 = vector.load %arg11[%c0_29, %c0_30] : memref<4x12xf32, #tpu.memory_space<vmem>>, vector<4x12xf32>
    %cst_31 = arith.constant dense<0.000000e+00> : vector<16x12xf32>
    %56 = tpu.matmul %54, %55, %cst_31 {dimension_numbers = #tpu.dot_dimension_numbers<[1], [0], [0], [1], [0, 0, 1, 1], [], []>} : vector<16x4xf32>, vector<4x12xf32>, vector<16x12xf32> -> vector<16x12xf32>
    %c0_32 = arith.constant 0 : index
    %c0_33 = arith.constant 0 : index
    %57 = vector.load %arg10[%c0_32, %c0_33] : memref<128x12xf32, #tpu.memory_space<vmem>>, vector<128x12xf32>
    %cst_34 = arith.constant dense<0.000000e+00> : vector<16x12xf32>
    %58 = tpu.matmul %48, %57, %cst_34 {dimension_numbers = #tpu.dot_dimension_numbers<[1], [0], [0], [1], [0, 0, 1, 1], [], []>} : vector<16x128xf32>, vector<128x12xf32>, vector<16x12xf32> -> vector<16x12xf32>
    %59 = arith.mulf %58, %56 : vector<16x12xf32>
    %c0_35 = arith.constant 0 : index
    %c0_36 = arith.constant 0 : index
    %60 = vector.load %arg12[%c0_35, %c0_36] : memref<1x12xf32, #tpu.memory_space<vmem>>, vector<1x12xf32>
    %61 = vector.broadcast %60 : vector<1x12xf32> to vector<16x12xf32>
    %62 = arith.addf %59, %61 : vector<16x12xf32>
    %63 = math.tanh %62 : vector<16x12xf32>
    %c0_37 = arith.constant 0 : index
    %c0_38 = arith.constant 0 : index
    %64 = vector.load %arg13[%c0_37, %c0_38] : memref<12x12xf32, #tpu.memory_space<vmem>>, vector<12x12xf32>
    %cst_39 = arith.constant dense<0.000000e+00> : vector<16x12xf32>
    %65 = tpu.matmul %63, %64, %cst_39 {dimension_numbers = #tpu.dot_dimension_numbers<[1], [0], [0], [1], [0, 0, 1, 1], [], []>} : vector<16x12xf32>, vector<12x12xf32>, vector<16x12xf32> -> vector<16x12xf32>
    %cst_40 = arith.constant dense<0xFF800000> : vector<16xf32>
    %66 = vector.multi_reduction <maximumf>, %65, %cst_40 [1] : vector<16x12xf32> to vector<16xf32>
    %67 = vector.shape_cast %66 : vector<16xf32> to vector<16x1xf32>
    %68 = vector.broadcast %67 : vector<16x1xf32> to vector<16x12xf32>
    %69 = arith.subf %65, %68 : vector<16x12xf32>
    %70 = math.exp %69 : vector<16x12xf32>
    %c0_41 = arith.constant 0 : index
    %c0_42 = arith.constant 0 : index
    %71 = vector.load %arg14[%c0_41, %c0_42] : memref<12x12xf32, #tpu.memory_space<vmem>>, vector<12x12xf32>
    %cst_43 = arith.constant dense<0.000000e+00> : vector<16x12xf32>
    %72 = tpu.matmul %70, %71, %cst_43 {dimension_numbers = #tpu.dot_dimension_numbers<[1], [0], [0], [1], [0, 0, 1, 1], [], []>} : vector<16x12xf32>, vector<12x12xf32>, vector<16x12xf32> -> vector<16x12xf32>
    %73 = arith.divf %70, %72 : vector<16x12xf32>
    %74 = vector.extract_strided_slice %47 {offsets = [0, 0], sizes = [16, 32], strides = [1, 1]} : vector<16x64xf32> to vector<16x32xf32>
    %75 = vector.extract_strided_slice %47 {offsets = [0, 32], sizes = [16, 32], strides = [1, 1]} : vector<16x64xf32> to vector<16x32xf32>
    %76 = vector.extract_strided_slice %45 {offsets = [0, 0], sizes = [16, 32], strides = [1, 1]} : vector<16x64xf32> to vector<16x32xf32>
    %77 = vector.extract_strided_slice %45 {offsets = [0, 32], sizes = [16, 32], strides = [1, 1]} : vector<16x64xf32> to vector<16x32xf32>
    %c0_44 = arith.constant 0 : index
    %c0_45 = arith.constant 0 : index
    %78 = vector.load %arg15[%c0_44, %c0_45] : memref<32x4xf32, #tpu.memory_space<vmem>>, vector<32x4xf32>
    %79 = arith.mulf %74, %75 : vector<16x32xf32>
    %cst_46 = arith.constant dense<0.000000e+00> : vector<16x4xf32>
    %80 = tpu.matmul %79, %78, %cst_46 {dimension_numbers = #tpu.dot_dimension_numbers<[1], [0], [0], [1], [0, 0, 1, 1], [], []>} : vector<16x32xf32>, vector<32x4xf32>, vector<16x4xf32> -> vector<16x4xf32>
    %81 = arith.mulf %74, %76 : vector<16x32xf32>
    %cst_47 = arith.constant dense<0.000000e+00> : vector<16x4xf32>
    %82 = tpu.matmul %81, %78, %cst_47 {dimension_numbers = #tpu.dot_dimension_numbers<[1], [0], [0], [1], [0, 0, 1, 1], [], []>} : vector<16x32xf32>, vector<32x4xf32>, vector<16x4xf32> -> vector<16x4xf32>
    %83 = arith.mulf %74, %77 : vector<16x32xf32>
    %cst_48 = arith.constant dense<0.000000e+00> : vector<16x4xf32>
    %84 = tpu.matmul %83, %78, %cst_48 {dimension_numbers = #tpu.dot_dimension_numbers<[1], [0], [0], [1], [0, 0, 1, 1], [], []>} : vector<16x32xf32>, vector<32x4xf32>, vector<16x4xf32> -> vector<16x4xf32>
    %c0_49 = arith.constant 0 : index
    %c0_50 = arith.constant 0 : index
    %85 = vector.load %arg16[%c0_49, %c0_50] : memref<12x8xf32, #tpu.memory_space<vmem>>, vector<12x8xf32>
    %cst_51 = arith.constant dense<0.000000e+00> : vector<16x8xf32>
    %86 = tpu.matmul %73, %85, %cst_51 {dimension_numbers = #tpu.dot_dimension_numbers<[1], [0], [0], [1], [0, 0, 1, 1], [], []>} : vector<16x12xf32>, vector<12x8xf32>, vector<16x8xf32> -> vector<16x8xf32>
    %87 = vector.extract_strided_slice %86 {offsets = [0, 0], sizes = [16, 4], strides = [1, 1]} : vector<16x8xf32> to vector<16x4xf32>
    %88 = vector.extract_strided_slice %86 {offsets = [0, 4], sizes = [16, 4], strides = [1, 1]} : vector<16x8xf32> to vector<16x4xf32>
    %cst_52 = arith.constant 0.000000e+00 : f32
    %89 = vector.broadcast %cst_52 : f32 to vector<16x4xf32>
    %90 = arith.maximumf %80, %89 : vector<16x4xf32>
    %91 = math.absf %80 : vector<16x4xf32>
    %cst_53 = arith.constant 0.000000e+00 : f32
    %92 = vector.broadcast %cst_53 : f32 to vector<16x4xf32>
    %93 = arith.subf %92, %91 : vector<16x4xf32>
    %94 = math.exp %93 : vector<16x4xf32>
    %cst_54 = arith.constant 1.000000e+00 : f32
    %95 = vector.broadcast %cst_54 : f32 to vector<16x4xf32>
    %96 = arith.addf %95, %94 : vector<16x4xf32>
    %97 = math.log %96 : vector<16x4xf32>
    %98 = arith.addf %90, %97 : vector<16x4xf32>
    %99 = arith.mulf %87, %98 : vector<16x4xf32>
    %cst_55 = arith.constant 0.000000e+00 : f32
    %100 = vector.broadcast %cst_55 : f32 to vector<16x4xf32>
    %101 = arith.maximumf %82, %100 : vector<16x4xf32>
    %102 = math.absf %82 : vector<16x4xf32>
    %cst_56 = arith.constant 0.000000e+00 : f32
    %103 = vector.broadcast %cst_56 : f32 to vector<16x4xf32>
    %104 = arith.subf %103, %102 : vector<16x4xf32>
    %105 = math.exp %104 : vector<16x4xf32>
    %cst_57 = arith.constant 1.000000e+00 : f32
    %106 = vector.broadcast %cst_57 : f32 to vector<16x4xf32>
    %107 = arith.addf %106, %105 : vector<16x4xf32>
    %108 = math.log %107 : vector<16x4xf32>
    %109 = arith.addf %101, %108 : vector<16x4xf32>
    %cst_58 = arith.constant 0.000000e+00 : f32
    %110 = vector.broadcast %cst_58 : f32 to vector<16x4xf32>
    %111 = arith.maximumf %84, %110 : vector<16x4xf32>
    %112 = math.absf %84 : vector<16x4xf32>
    %cst_59 = arith.constant 0.000000e+00 : f32
    %113 = vector.broadcast %cst_59 : f32 to vector<16x4xf32>
    %114 = arith.subf %113, %112 : vector<16x4xf32>
    %115 = math.exp %114 : vector<16x4xf32>
    %cst_60 = arith.constant 1.000000e+00 : f32
    %116 = vector.broadcast %cst_60 : f32 to vector<16x4xf32>
    %117 = arith.addf %116, %115 : vector<16x4xf32>
    %118 = math.log %117 : vector<16x4xf32>
    %119 = arith.addf %111, %118 : vector<16x4xf32>
    %120 = arith.addf %109, %119 : vector<16x4xf32>
    %121 = arith.mulf %88, %120 : vector<16x4xf32>
    %122 = arith.addf %99, %121 : vector<16x4xf32>
    %c0_61 = arith.constant 0 : index
    %c0_62 = arith.constant 0 : index
    %123 = vector.load %arg17[%c0_61, %c0_62] : memref<4x64xf32, #tpu.memory_space<vmem>>, vector<4x64xf32>
    %cst_63 = arith.constant dense<0.000000e+00> : vector<16x64xf32>
    %124 = tpu.matmul %122, %123, %cst_63 {dimension_numbers = #tpu.dot_dimension_numbers<[1], [0], [0], [1], [0, 0, 1, 1], [], []>} : vector<16x4xf32>, vector<4x64xf32>, vector<16x64xf32> -> vector<16x64xf32>
    %125 = tpu.concatenate %45, %124 in 1 : vector<16x64xf32>, vector<16x64xf32> -> vector<16x128xf32>
    %126 = arith.truncf %125 : vector<16x128xf32> to vector<16x128xbf16>
    %c0_64 = arith.constant 0 : index
    %c0_65 = arith.constant 0 : index
    %127 = vector.load %arg18[%c0_64, %c0_65] : memref<16x128xbf16, #tpu.memory_space<vmem>>, vector<16x128xbf16>
    tpu.vector_store %arg18[%c0_64, %c0_65], %126 {strides = array<i32>} : memref<16x128xbf16, #tpu.memory_space<vmem>>, vector<16x128xbf16>,
    return
  }
  func.func @transform_0(%arg0: i32) -> (i32, i32) {
    %c0_i32 = arith.constant 0 : i32
    %c0_i32_0 = arith.constant 0 : i32
    return %arg0, %c0_i32 : i32, i32
  }
  func.func @transform_1(%arg0: i32) -> (i32, i32) {
    %c0_i32 = arith.constant 0 : i32
    %c0_i32_0 = arith.constant 0 : i32
    return %arg0, %c0_i32 : i32, i32
  }
  func.func @transform_2(%arg0: i32) -> (i32, i32) {
    %c0_i32 = arith.constant 0 : i32
    %c0_i32_0 = arith.constant 0 : i32
    return %arg0, %c0_i32 : i32, i32
  }
  func.func @transform_3(%arg0: i32) -> (i32, i32) {
    %c0_i32 = arith.constant 0 : i32
    %c0_i32_0 = arith.constant 0 : i32
    %c0_i32_1 = arith.constant 0 : i32
    return %c0_i32, %c0_i32_0 : i32, i32
  }
  func.func @transform_4(%arg0: i32) -> (i32, i32) {
    %c0_i32 = arith.constant 0 : i32
    %c0_i32_0 = arith.constant 0 : i32
    %c0_i32_1 = arith.constant 0 : i32
    return %c0_i32, %c0_i32_0 : i32, i32
  }
  func.func @transform_5(%arg0: i32) -> (i32, i32) {
    %c0_i32 = arith.constant 0 : i32
    %c0_i32_0 = arith.constant 0 : i32
    %c0_i32_1 = arith.constant 0 : i32
    return %c0_i32, %c0_i32_0 : i32, i32
  }
  func.func @transform_6(%arg0: i32) -> (i32, i32) {
    %c0_i32 = arith.constant 0 : i32
    %c0_i32_0 = arith.constant 0 : i32
    %c0_i32_1 = arith.constant 0 : i32
    return %c0_i32, %c0_i32_0 : i32, i32
  }
  func.func @transform_7(%arg0: i32) -> (i32, i32) {
    %c0_i32 = arith.constant 0 : i32
    %c0_i32_0 = arith.constant 0 : i32
    %c0_i32_1 = arith.constant 0 : i32
    return %c0_i32, %c0_i32_0 : i32, i32
  }
  func.func @transform_8(%arg0: i32) -> (i32, i32) {
    %c0_i32 = arith.constant 0 : i32
    %c0_i32_0 = arith.constant 0 : i32
    %c0_i32_1 = arith.constant 0 : i32
    return %c0_i32, %c0_i32_0 : i32, i32
  }
  func.func @transform_9(%arg0: i32) -> (i32, i32) {
    %c0_i32 = arith.constant 0 : i32
    %c0_i32_0 = arith.constant 0 : i32
    %c0_i32_1 = arith.constant 0 : i32
    return %c0_i32, %c0_i32_0 : i32, i32
  }
  func.func @transform_10(%arg0: i32) -> (i32, i32) {
    %c0_i32 = arith.constant 0 : i32
    %c0_i32_0 = arith.constant 0 : i32
    %c0_i32_1 = arith.constant 0 : i32
    return %c0_i32, %c0_i32_0 : i32, i32
  }
  func.func @transform_11(%arg0: i32) -> (i32, i32) {
    %c0_i32 = arith.constant 0 : i32
    %c0_i32_0 = arith.constant 0 : i32
    %c0_i32_1 = arith.constant 0 : i32
    return %c0_i32, %c0_i32_0 : i32, i32
  }
  func.func @transform_12(%arg0: i32) -> (i32, i32) {
    %c0_i32 = arith.constant 0 : i32
    %c0_i32_0 = arith.constant 0 : i32
    %c0_i32_1 = arith.constant 0 : i32
    return %c0_i32, %c0_i32_0 : i32, i32
  }
  func.func @transform_13(%arg0: i32) -> (i32, i32) {
    %c0_i32 = arith.constant 0 : i32
    %c0_i32_0 = arith.constant 0 : i32
    %c0_i32_1 = arith.constant 0 : i32
    return %c0_i32, %c0_i32_0 : i32, i32
  }
  func.func @transform_14(%arg0: i32) -> (i32, i32) {
    %c0_i32 = arith.constant 0 : i32
    %c0_i32_0 = arith.constant 0 : i32
    %c0_i32_1 = arith.constant 0 : i32
    return %c0_i32, %c0_i32_0 : i32, i32
  }
  func.func @transform_15(%arg0: i32) -> (i32, i32) {
    %c0_i32 = arith.constant 0 : i32
    %c0_i32_0 = arith.constant 0 : i32
    %c0_i32_1 = arith.constant 0 : i32
    return %c0_i32, %c0_i32_0 : i32, i32
  }
  func.func @transform_16(%arg0: i32) -> (i32, i32) {
    %c0_i32 = arith.constant 0 : i32
    %c0_i32_0 = arith.constant 0 : i32
    %c0_i32_1 = arith.constant 0 : i32
    return %c0_i32, %c0_i32_0 : i32, i32
  }
  func.func @transform_17(%arg0: i32) -> (i32, i32) {
    %c0_i32 = arith.constant 0 : i32
    %c0_i32_0 = arith.constant 0 : i32
    return %arg0, %c0_i32 : i32, i32
  }
}

</mosaic_0001>

<bundles_post_ra>
// kernel: tpu_custom_call.1
= control target key start
LH: loop header
LB: loop body
LE: loop exit
PB: predicated region body
PF: predicated region fallthrough
CT: control target
= control target key end

     0   :  { %s3657_s0 = inlined_call_operand.vmem [shape: bf16[32,64], index: 0, kind: input, shape index: {}]   ;;  %s3658_s1 = inlined_call_operand.vmem [shape: bf16[32,64], index: 1, kind: input, shape index: {}]   ;;  %s3659_s2 = inlined_call_operand.vmem [shape: bf16[32,48], index: 2, kind: input, shape index: {}]   ;;  %s3660_s3 = inlined_call_operand.vmem [shape: bf16[64,384], index: 3, kind: input, shape index: {}]   ;;  %s3661_s4 = inlined_call_operand.vmem [shape: bf16[48,384], index: 4, kind: input, shape index: {}]   ;;  %s3662_s5 = inlined_call_operand.vmem [shape: f32[1,384], index: 5, kind: input, shape index: {}]   ;;  %s3663_s6 = inlined_call_operand.vmem [shape: bf16[384,64], index: 6, kind: input, shape index: {}]   ;;  %s3664_s7 = inlined_call_operand.vmem [shape: f32[1,64], index: 7, kind: input, shape index: {}]   ;;  %s3665_s8 = inlined_call_operand.vmem [shape: f32[128,4], index: 8, kind: input, shape index: {}]   ;;  %s3666_s9 = inlined_call_operand.vmem [shape: f32[128,12], index: 9, kind: input, shape index: {}]   ;;  %s3667_s10 = inlined_call_operand.vmem [shape: f32[4,12], index: 10, kind: input, shape index: {}]   ;;  %s3668_s11 = inlined_call_operand.vmem [shape: f32[1,12], index: 11, kind: input, shape index: {}]   ;;  %s3669_s12 = inlined_call_operand.vmem [shape: f32[12,12], index: 12, kind: input, shape index: {}]   ;;  %s3670_s13 = inlined_call_operand.vmem [shape: f32[12,12], index: 13, kind: input, shape index: {}]   ;;  %s3671_s14 = inlined_call_operand.vmem [shape: f32[32,4], index: 14, kind: input, shape index: {}]   ;;  %s3672_s15 = inlined_call_operand.vmem [shape: f32[12,8], index: 15, kind: input, shape index: {}]   ;;  %s3673_s16 = inlined_call_operand.vmem [shape: f32[4,64], index: 16, kind: input, shape index: {}]   ;;  %s3674_s17 = inlined_call_operand.hbm [shape: bf16[32,128], index: 17, kind: output, shape index: {}]  }
   0x1   :  { %3680 = sst [smem:[#allocation8_spill]] %s3657_s0 }
   0x2   :  { %3681 = sst [smem:[#allocation9_spill]] %s3658_s1 }
   0x3   :  { %3682 = sst [smem:[#allocation10_spill]] %s3659_s2 }
   0x4   :  { %3683 = sst [smem:[#allocation11_spill]] %s3660_s3 }
   0x5   :  { %22 = vsyncpa [#allocation3], 0 }
   0x6   :  { %24 = vsyncpa [#allocation3 + $0x1], 0  ;;  %s3122_s24 = smov 0   ;;  %s3124_s25 = smov 0  }
   0x7   :  { %s3126_s26 = smov 0   ;;  %s3128_s27 = smov 0  }
   0x8 LB: > { %3684 = sst [smem:[#allocation5_spill]] %s3018_s26  ;;  %s3143_s28 = sadd.s32 4294967295, %s3022_s27   ;;  %s3022_s27 = sphi %s3128_s27, %s3695_s27   ;;  %s3018_s26 = sphi %s3126_s26, %s3697_s26   ;;  %s3014_s25 = sphi %s3124_s25, %s3699_s25   ;;  %s3010_s24 = sphi %s3122_s24, %s3698_s24  }
   0x9   : > { %s2408_s29 = sadd.s32 4294967294, %s3022_s27   ;;  %s3147_s0 = sadd.s32 1, %s3022_s27  }
   0xa   : > { %3685 = sst [smem:[#allocation6_spill]] %s3147_s0  ;;  %s409_s30 = sadd.s32 1, %s3018_s26 }
   0xb   : > { %s406_s18 = ssub.s32 %s3022_s27, %s3147_s0  ;;  %p419_p0 = scmp.ne.s32.totalorder %s3018_s26, %s3014_s25 }
   0xc   : > { %p407_p1 = scmp.eq.s32.totalorder %s406_s18, 0  ;;  %p420_p2 = scmp.eq.s32.totalorder %s3143_s28, 1 }
   0xd   : > { %p425_p3 = scmp.ne.s32.totalorder %s3014_s25, %s3010_s24  ;;  %p426_p4 = scmp.eq.s32.totalorder %s2408_s29, 1 }
   0xe   : > { %s3158_s19 = scalar_select %p407_p1, %s3018_s26, %s409_s30  }
   0xf   : > { %p3160_p5 = por %p420_p2, %p419_p0  ;;  %p3164_p6 = por %p426_p4, %p425_p3 }
  0x10   : > { %3686 = sst [smem:[#allocation7_spill]] %s3158_s19  ;;  %p2411_p7 = scmp.ge.s32.totalorder %s3022_s27, 1 }
  0x11   : > { %p513_p8 = scmp.lt.s32.totalorder %s3022_s27, 3 }
  0x13   : > { %p514_p9 = pnand %p2411_p7, %p513_p8 }
  0x14   : > { %s2413_s21 = sshll.u32 (!%p514_p9), %s3143_s28, 1  ;;  %s3689_s2 = sld [smem:[#allocation10_spill]] (!%p514_p9) }
  0x15   : > { %517 = sbr.rel (%p514_p9) target bundleno = 2417 (0x971), region = 88  ;;  %p576_p10 = scmp.lt.s32.totalorder (!%p514_p9), %s2413_s21, 3 }
  0x16   : > { %s3690_s26 = sld [smem:[#allocation9_spill]] (!%p514_p9) }
  0x17   : > { %s3691_s3 = sld [smem:[#allocation11_spill]] (!%p514_p9) }
  0x1a   : > { %s3701_s21 = smov (!%p576_p10, %s2413_s21), 3  ;;  %vm620_vm0 = vcmask 392192   ;;  %vm605_vm1 = vcmask 523264   ;;  %v2862_v14 = vld [vmem:[%s3661_s4 + $0x34] ss:$12 sps:$4 sm:$0xff]   ;;  %v3024_v16 = vmov 0.0  }
  0x1b   : > { %s3171_s22 = sshll.u32 %s3701_s21, 2  ;;  %v2864_v15 = vld [vmem:[%s3661_s4 + $0x30] ss:$12 sps:$4 sm:$0xff]   ;;  %2630 = vmatprep.subr.bf16.mxu1 %v3024_v16  ;;  %v2865_v17 = vld [vmem:[%s3661_s4 + $0x38] ss:$12 sps:$4 sm:$0xff]   ;;  %724 = vmatprep.subr.bf16.mxu0 %v2862_v14  ;;  %v3025_v22 = vmov 0  }
  0x1c   : > { %s591_s30 = scalar_lea.vmem %s3689_s2, %s3171_s22  ;;  %s585_s0 = scalar_lea.vmem %s3690_s26, %s3171_s22  ;;  %v2866_v18 = vld [vmem:[%s3661_s4 + $0x1c] ss:$12 sps:$4 sm:$0xff]   ;;  %725 = vmatpush1.bf16.msra.mxu0 %v2864_v15  ;;  %2631 = vmatpush3.bf16.msra.mxu1 %v2865_v17  ;;  %v2868_v19 = vld [vmem:[%s3661_s4 + $0x18] ss:$12 sps:$4 sm:$0xff]   ;;  %v2869_v20 = vld [vmem:[%s3661_s4 + $0x20] ss:$12 sps:$4 sm:$0xff]  }
  0x1d   : > { %v2506_v0 = vld [vmem:[%s591_s30] sm:$0xff]   ;;  %726 = vmatprep.subr.bf16.mxu0 %v2866_v18  ;;  %2632 = vmatprep.subr.bf16.mxu1 %v3024_v16  ;;  %vm3026_vm2 = vmmov 0   ;;  %v2873_v24 = vld [vmem:[%s3661_s4 + $0x8] ss:$12 sps:$4 sm:$0xff]   ;;  %v2876_v25 = vld [vmem:[%s3691_s3 + $0x4c] ss:$12 sps:$4 sm:$0xff]  }
  0x1e   : > { %v2507_v1 = vunpack.c.l.bf16 %v2506_v0  ;;  %v2508_v2 = vunpack.c.h.bf16 %v2506_v0  ;;  %v2502_v3 = vld [vmem:[%s585_s0] sm:$0xff]   ;;  %746 = vmatprep.mubr.bf16.mxu0 %v3025_v22  ;;  %2636 = vmatprep.mubr.msk.bf16.mxu1 %vm3026_vm2, %v3024_v16  ;;  %v2874_v38 = vld [vmem:[%s3691_s3 + $0x48] ss:$12 sps:$4 sm:$0xff]   ;;  %v2877_v39 = vld [vmem:[%s3691_s3 + $0x50] ss:$12 sps:$4 sm:$0xff]   ;;  %s3678_s30 = smov 64  }
  0x1f   : > { %v3181_v4 = vunpack.c.l.bf16 %v2502_v3  ;;  %v3183_v5 = vunpack.c.h.bf16 %v2502_v3  ;;  %v2870_v21 = vld [vmem:[%s3661_s4 + $0x4] ss:$12 sps:$4 sm:$0xff]   ;;  %v2872_v23 = vld [vmem:[%s3661_s4] ss:$12 sps:$4 sm:$0xff]   ;;  %v2884_v44 = vld [vmem:[%s3691_s3 + $0x1c] ss:$12 sps:$4 sm:$0xff]  }
  0x20   : > { %v618_v6 = vmul.f32 %v2507_v1, %v2507_v1  ;;  %v619_v7 = vmul.f32 %v2508_v2, %v2508_v2  ;;  %727 = vmatpush1.bf16.msra.mxu0 %v2868_v19  ;;  %2633 = vmatpush3.bf16.msra.mxu1 %v2869_v20  ;;  %v2880_v41 = vld [vmem:[%s3691_s3 + $0x34] ss:$12 sps:$4 sm:$0xff]   ;;  %v2878_v42 = vld [vmem:[%s3691_s3 + $0x30] ss:$12 sps:$4 sm:$0xff]   ;;  %v2881_v43 = vld [vmem:[%s3691_s3 + $0x38] ss:$12 sps:$4 sm:$0xff]   ;;  %v951_v19 = vlaneseq }
  0x21   : > { %v603_v8 = vmul.f32 %v3181_v4, %v3181_v4  ;;  %v604_v9 = vmul.f32 %v3183_v5, %v3183_v5  ;;  %728 = vmatprep.subr.bf16.mxu0 %v2870_v21  ;;  %2634 = vmatprep.subr.bf16.mxu1 %v3024_v16  ;;  %v2882_v45 = vld [vmem:[%s3691_s3 + $0x18] ss:$12 sps:$4 sm:$0xff]   ;;  %v2885_v46 = vld [vmem:[%s3691_s3 + $0x20] ss:$12 sps:$4 sm:$0xff]   ;;  %v2889_v51 = vld [vmem:[%s3691_s3 + $0x8] ss:$12 sps:$4 sm:$0xff]  }
  0x22   : > { %v621_v10 = vsel %vm620_vm0, %v618_v6, 0.0  ;;  %v624_v11 = vsel %vm620_vm0, %v619_v7, 0.0  ;;  %v2888_v48 = vld [vmem:[%s3691_s3 + $0x4] ss:$12 sps:$4 sm:$0xff]   ;;  %v2886_v50 = vld [vmem:[%s3691_s3] ss:$12 sps:$4 sm:$0xff]  }
  0x23   : > { %622 = vadd.xlane.f32.xlu0 %v621_v10  ;;  %v606_v12 = vsel %vm605_vm1, %v603_v8, 0.0  ;;  %v609_v13 = vsel %vm605_vm1, %v604_v9, 0.0  ;;  %v2890_v54 = vld [vmem:[%s3663_s6 + $0xb8] sm:$0xff]   ;;  %v2893_v58 = vld [vmem:[%s3663_s6 + $0xb0] sm:$0xff]   ;;  %v2896_v61 = vld [vmem:[%s3663_s6 + $0xa8] sm:$0xff]   ;;  %s3692_s0 = sld [smem:[#allocation8_spill]] }
  0x24   : > { %607 = vadd.xlane.f32.xlu1 %v606_v12  ;;  %729 = vmatpush1.bf16.msra.mxu0 %v2872_v23  ;;  %v2891_v56 = vld [vmem:[%s3663_s6 + $0x78] sm:$0xff]   ;;  %v2894_v59 = vld [vmem:[%s3663_s6 + $0x70] sm:$0xff]   ;;  %v2897_v62 = vld [vmem:[%s3663_s6 + $0x68] sm:$0xff]   ;;  %vm1399_vm11 = vcmask 1043456   ;;  %vm1392_vm12 = vcmask 31744   ;;  %vm1785_vm13 = vcmask 261120  }
  0x25   : > { %2635 = vmatpush3.bf16.msra.mxu1 %v2873_v24  ;;  %873 = vmatprep.subr.bf16.mxu0 %v2876_v25  ;;  %v2892_v57 = vld [vmem:[%s3663_s6 + $0x38] sm:$0xff]   ;;  %v2895_v60 = vld [vmem:[%s3663_s6 + $0x30] sm:$0xff]   ;;  %v2898_v63 = vld [vmem:[%s3663_s6 + $0x28] sm:$0xff]   ;;  %vm1584_vm14 = vcmask 97280   ;;  %s3679_s26 = smov 4   ;;  %s572_s2 = sand.u32 1, %s3014_s25  }
  0x26   : > { %2640 = vmatprep.subr.bf16.mxu1 %v3024_v16  ;;  %v2899_v0 = vld [vmem:[%s3663_s6 + $0xa0] sm:$0xff]   ;;  %v2902_v3 = vld [vmem:[%s3663_s6 + $0x98] sm:$0xff]   ;;  %v2905_v6 = vld [vmem:[%s3663_s6 + $0x90] sm:$0xff]   ;;  %s2412_s3 = sshll.u32 %s572_s2, 3  ;;  %s2500_s21 = sshll.u32 %s3143_s28, 7 }
  0x27   : > { %625 = vadd.xlane.f32.xlu0 %v624_v11  ;;  %v2906_v7 = vld [vmem:[%s3663_s6 + $0x50] sm:$0xff]   ;;  %v2908_v9 = vld [vmem:[%s3663_s6 + $0x88] sm:$0xff]   ;;  %v2911_v12 = vld [vmem:[%s3663_s6 + $0x80] sm:$0xff]   ;;  %s574_s23 = scalar_lea.vmem [#allocation2], %s2412_s3  ;;  %s2309_s28 = scalar_lea.sflag [#allocation3], %s572_s2 }
  0x28   : > { %610 = vadd.xlane.f32.xlu1 %v609_v13  ;;  %v2907_v8 = vld [vmem:[%s3663_s6 + $0x10] sm:$0xff]   ;;  %v2909_v10 = vld [vmem:[%s3663_s6 + $0x48] sm:$0xff]   ;;  %v2912_v13 = vld [vmem:[%s3663_s6 + $0x40] sm:$0xff]   ;;  %s2322_s29 = sshll.u32 %s574_s23, 4  ;;  %s3031_s3 = smov [#allocation2]   ;;  %s3615_s29 = int_to_ptr.vmem [resolvable:$true] %s2322_s29 }
  0x29   : > { %v2910_v11 = vld [vmem:[%s3663_s6 + $0x8] sm:$0xff]   ;;  %v2913_v14 = vld [vmem:[%s3663_s6] sm:$0xff]   ;;  %s579_s19 = scalar_lea.vmem %s3692_s0, %s3171_s22  ;;  %s3028_s0 = smov 96  }
  0x2a   : > { %s3030_s22 = smov 124  }
  0xac   : > { %v623_v26 = vpop.xlane.xlu0 %622 }
  0xad   : > { %v627_v27 = vmax.f32 %v623_v26, 1e-24  ;;  %v608_v30 = vpop.xlane.xlu1 %607  ;;  %v949_v26 = vld [vmem:[%s3662_s5] sm:$0x7] }
  0xae   : > { %v612_v32 = vmax.f32 %v608_v30, 1e-24 }
  0xaf   : > { %2914 = vrsqrt.f32 %v627_v27 }
  0xb0   : > { %v626_v28 = vpop.xlane.xlu0 %625 }
  0xb1   : > { %v628_v29 = vmax.f32 %v626_v28, 1e-24  ;;  %v611_v31 = vpop.xlane.xlu1 %610 }
  0xb2   : > { %v613_v33 = vmax.f32 %v611_v31, 1e-24 }
  0xb3   : > { %2916 = vrsqrt.f32 %v628_v29 }
  0xb4   : > { %2918 = vrsqrt.f32 %v612_v32 }
  0xb5   : > { %2920 = vrsqrt.f32 %v613_v33 }
  0xbc   : > { %v2915_v34 = vpop.eup %2914 }
  0xbd   : > { %v631_v36 = vmul.f32 %v2915_v34, %v2507_v1  ;;  %v2900_v1 = vld [vmem:[%s3663_s6 + $0x60] sm:$0xff]  }
  0xc0   : > { %v2917_v35 = vpop.eup %2916 }
  0xc1   : > { %v632_v37 = vmul.f32 %v2917_v35, %v2508_v2  ;;  %v2919_v47 = vpop.eup %2918  ;;  %v2901_v2 = vld [vmem:[%s3663_s6 + $0x20] sm:$0xff]  }
  0xc2   : > { %v2921_v49 = vpop.eup %2920  ;;  %v616_v52 = vmul.f32 %v2919_v47, %v3181_v4  ;;  %v2903_v4 = vld [vmem:[%s3663_s6 + $0x58] sm:$0xff]  }
  0xc3   : > { %v650_v40 = vpack.c.bf16 %v632_v37, %v631_v36  ;;  %v617_v53 = vmul.f32 %v2921_v49, %v3183_v5  ;;  %v2904_v5 = vld [vmem:[%s3663_s6 + $0x18] sm:$0xff]  }
  0xc5   : > { %2428 = vmatmul.mubr.msk.bf16.vlgmr.msra.gmra.mxu0 %vm620_vm0, %v650_v40  ;;  %2637 = vmatmul.mubr.msk.bf16.vlgmr.msra.gmra.mxu1 %vm620_vm0, %v650_v40  ;;  %v633_v55 = vpack.c.bf16 %v617_v53, %v616_v52 }
  0xc6   : > { %874 = vmatpush1.bf16.msra.mxu0 %v2874_v38  ;;  %2641 = vmatpush3.bf16.msra.mxu1 %v2877_v39 }
  0xc7   : > { %875 = vmatprep.subr.bf16.mxu0 %v2880_v41  ;;  %2642 = vmatprep.subr.bf16.mxu1 %v3024_v16 }
  0xc8   : > { %897 = vmatprep.mubr.bf16.mxu0 %v3025_v22  ;;  %2648 = vmatprep.mubr.msk.bf16.mxu1 %vm3026_vm2, %v3024_v16  ;;  %v952_v22 = vshrl.u32 %v951_v19, 7  ;;  %v1298_v19 = vld [vmem:[%s3665_s8 + $0x10] sm:$0xff] }
  0xca   : > { %876 = vmatpush1.bf16.msra.mxu0 %v2878_v42  ;;  %2643 = vmatpush3.bf16.msra.mxu1 %v2881_v43  ;;  %v953_v24 = vsub.s32 0, %v952_v22  ;;  %v961_v25 = vsub.s32 2, %v952_v22  ;;  %v957_v28 = vsub.s32 1, %v952_v22  ;;  %v2444_v22 = vld [vmem:[%s3664_s7] ss:$0 sm:$0xff] }
  0xcb   : > { %877 = vmatprep.subr.bf16.mxu0 %v2884_v44  ;;  %2644 = vmatprep.subr.bf16.mxu1 %v3024_v16 }
  0xcc   : > { %v954_v30 = vrot.slane %v949_v26, %v953_v24  ;;  %v962_v32 = vrot.slane %v949_v26, %v961_v25  ;;  %v958_v36 = vrot.slane %v949_v26, %v957_v28 }
  0xce   : > { %878 = vmatpush1.bf16.msra.mxu0 %v2882_v45  ;;  %2645 = vmatpush3.bf16.msra.mxu1 %v2885_v46 }
  0xcf   : > { %879 = vmatprep.subr.bf16.mxu0 %v2888_v48  ;;  %2646 = vmatprep.subr.bf16.mxu1 %v3024_v16 }
  0xd2   : > { %880 = vmatpush1.bf16.msra.mxu0 %v2886_v50  ;;  %2647 = vmatpush3.bf16.msra.mxu1 %v2889_v51 }
  0xd3   : > { %2652 = vmatprep.subr.bf16.mxu1 %v3024_v16  ;;  %2527 = vmatprep.subr.bf16.mxu0 %v2891_v56 }
  0xd5   : > { %2442 = vmatmul.mubr.msk.bf16.vlgmr.msra.gmra.mxu0 %vm605_vm1, %v633_v55  ;;  %2649 = vmatmul.mubr.msk.bf16.vlgmr.msra.gmra.mxu1 %vm605_vm1, %v633_v55 }
  0xd6   : > { %2653 = vmatpush3.bf16.msra.mxu1 %v2890_v54  ;;  %2668 = vmatprep.mubr.msk.bf16.mxu1 %vm3026_vm2, %v3024_v16 }
  0xd7   : > { %2654 = vmatprep.subr.bf16.mxu1 %v3024_v16  ;;  %2528 = vmatpush3.bf16.msra.mxu0 %v2892_v57 }
  0xd8   : > { %2529 = vmatprep.subr.bf16.mxu0 %v2894_v59 }
  0xda   : > { %2655 = vmatpush3.bf16.msra.mxu1 %v2893_v58 }
  0xdb   : > { %2656 = vmatprep.subr.bf16.mxu1 %v3024_v16  ;;  %2530 = vmatpush3.bf16.msra.mxu0 %v2895_v60 }
  0xdc   : > { %2531 = vmatprep.subr.bf16.mxu0 %v2897_v62 }
  0xde   : > { %2657 = vmatpush3.bf16.msra.mxu1 %v2896_v61 }
  0xdf   : > { %2658 = vmatprep.subr.bf16.mxu1 %v3024_v16  ;;  %2532 = vmatpush3.bf16.msra.mxu0 %v2898_v63 }
  0xe0   : > { %2533 = vmatprep.subr.bf16.mxu0 %v2900_v1 }
  0xe2   : > { %2659 = vmatpush3.bf16.msra.mxu1 %v2899_v0 }
  0xe3   : > { %2660 = vmatprep.subr.bf16.mxu1 %v3024_v16  ;;  %2534 = vmatpush3.bf16.msra.mxu0 %v2901_v2 }
  0xe4   : > { %2535 = vmatprep.subr.bf16.mxu0 %v2903_v4  ;;  %v1310_v4 = vld [vmem:[%s3665_s8 + $0x70] sm:$0xff] }
  0xe6   : > { %2661 = vmatpush3.bf16.msra.mxu1 %v2902_v3  ;;  %v1311_v3 = vld [vmem:[%s3665_s8 + $0x78] sm:$0xff] }
  0xe7   : > { %2662 = vmatprep.subr.bf16.mxu1 %v3024_v16  ;;  %2536 = vmatpush3.bf16.msra.mxu0 %v2904_v5  ;;  %v1309_v5 = vld [vmem:[%s3665_s8 + $0x68] sm:$0xff] }
  0xe8   : > { %2537 = vmatprep.subr.bf16.mxu0 %v2906_v7  ;;  %v1307_v7 = vld [vmem:[%s3665_s8 + $0x58] sm:$0xff] }
  0xea   : > { %2663 = vmatpush3.bf16.msra.mxu1 %v2905_v6  ;;  %v1308_v6 = vld [vmem:[%s3665_s8 + $0x60] sm:$0xff] }
  0xeb   : > { %2664 = vmatprep.subr.bf16.mxu1 %v3024_v16  ;;  %2538 = vmatpush3.bf16.msra.mxu0 %v2907_v8  ;;  %v1306_v8 = vld [vmem:[%s3665_s8 + $0x50] sm:$0xff] }
  0xec   : > { %2539 = vmatprep.subr.bf16.mxu0 %v2909_v10  ;;  %v1304_v10 = vld [vmem:[%s3665_s8 + $0x40] sm:$0xff] }
  0xee   : > { %2665 = vmatpush3.bf16.msra.mxu1 %v2908_v9  ;;  %v1305_v9 = vld [vmem:[%s3665_s8 + $0x48] sm:$0xff] }
  0xef   : > { %2666 = vmatprep.subr.bf16.mxu1 %v3024_v16  ;;  %2540 = vmatpush3.bf16.msra.mxu0 %v2910_v11  ;;  %v1303_v11 = vld [vmem:[%s3665_s8 + $0x38] sm:$0xff] }
  0xf0   : > { %2541 = vmatprep.subr.bf16.mxu0 %v2912_v13  ;;  %v1301_v13 = vld [vmem:[%s3665_s8 + $0x28] sm:$0xff] }
  0xf2   : > { %2667 = vmatpush3.bf16.msra.mxu1 %v2911_v12  ;;  %v1302_v12 = vld [vmem:[%s3665_s8 + $0x30] sm:$0xff] }
  0xf3   : > { %2542 = vmatpush3.bf16.msra.mxu0 %v2913_v14  ;;  %v1300_v14 = vld [vmem:[%s3665_s8 + $0x20] sm:$0xff] }
  0xf4   : > { %2672 = vmatprep.subr.mxu0 %v1311_v3 }
 0x185   : > { %v791_v15 = vpop.f32.mrf.mxu1  ;;  %v748_v17 = vpop.f32.mrf.mxu0 }
 0x187   : > { %v2638_v16 = vpop.f32.mrf.mxu1  ;;  %v750_v20 = vpop.f32.mrf.mxu0 }
 0x189   : > { %v794_v18 = vpop.f32.mrf.mxu1  ;;  %v752_v23 = vpop.f32.mrf.mxu0 }
 0x18b   : > { %v2639_v21 = vpop.f32.mrf.mxu1  ;;  %v754_v27 = vpop.f32.mrf.mxu0 }
 0x195   : > { %v899_v29 = vpop.f32.mrf.mxu0  ;;  %v942_v31 = vpop.f32.mrf.mxu1 }
 0x196   : > { %v900_v33 = vadd.f32 %v899_v29, %v748_v17  ;;  %v943_v34 = vadd.f32 %v942_v31, %v791_v15  ;;  %v1299_v15 = vld [vmem:[%s3665_s8 + $0x18] sm:$0xff] }
 0x197   : > { %v901_v35 = vpop.f32.mrf.mxu0  ;;  %v2650_v37 = vpop.f32.mrf.mxu1 }
 0x198   : > { %v902_v38 = vadd.f32 %v901_v35, %v750_v20  ;;  %v966_v39 = vadd.f32 %v954_v30, %v900_v33  ;;  %v968_v40 = vadd.f32 %v962_v32, %v943_v34  ;;  %v1297_v20 = vld [vmem:[%s3665_s8 + $0x8] sm:$0xff] }
 0x199   : > { %v903_v41 = vpop.f32.mrf.mxu0  ;;  %v945_v42 = vpop.f32.mrf.mxu1 }
 0x19a   : > { %v967_v43 = vadd.f32 %v958_v36, %v902_v38  ;;  %v904_v44 = vadd.f32 %v903_v41, %v752_v23  ;;  %v946_v45 = vadd.f32 %v945_v42, %v794_v18  ;;  %v978_v49 = vmul.f32 0.01, %v966_v39  ;;  %v2510_v38 = vld [vmem:[%s579_s19] sm:$0xff]   ;;  %s3613_s19 = scalar_lea.hbm %s3674_s17, %s2500_s21 }
 0x19b   : > { %v905_v46 = vpop.f32.mrf.mxu0  ;;  %v2651_v47 = vpop.f32.mrf.mxu1  ;;  %v980_v50 = vmul.f32 0.01, %v968_v40  ;;  %vm974_vm3 = vcmp.gt.f32.partialorder %v968_v40, 0.0  ;;  %vm972_vm7 = vcmp.gt.f32.partialorder %v966_v39, 0.0 }
 0x19c   : > { %v906_v48 = vadd.f32 %v905_v46, %v754_v27  ;;  %v969_v51 = vadd.f32 %v954_v30, %v904_v44  ;;  %v971_v52 = vadd.f32 %v962_v32, %v946_v45  ;;  %vm973_vm4 = vcmp.gt.f32.partialorder %v967_v43, 0.0  ;;  %v1296_v27 = vld [vmem:[%s3665_s8] sm:$0xff] }
 0x19d   : > { %v979_v53 = vmul.f32 0.01, %v967_v43  ;;  %v986_v58 = vsel %vm974_vm3, %v968_v40, %v980_v50  ;;  %v984_v0 = vsel %vm972_vm7, %v966_v39, %v978_v49  ;;  %v3421_v39 = vunpack.c.l.bf16 %v2510_v38  ;;  %v1391_v47 = vld [vmem:[%s3667_s10] sm:$0xf] }
 0x19e   : > { %v970_v54 = vadd.f32 %v958_v36, %v906_v48  ;;  %vm975_vm5 = vcmp.gt.f32.partialorder %v969_v51, 0.0  ;;  %v981_v55 = vmul.f32 0.01, %v969_v51  ;;  %vm977_vm6 = vcmp.gt.f32.partialorder %v971_v52, 0.0  ;;  %2707 = vmatprep.subr.msk.mxu1 %vm1399_vm11, %v1391_v47  ;;  %v1493_v48 = vld [vmem:[%s3666_s9 + $0x78] sm:$0xff] }
 0x19f   : > { %v983_v56 = vmul.f32 0.01, %v971_v52  ;;  %v985_v62 = vsel %vm973_vm4, %v967_v43, %v979_v53  ;;  %v3425_v43 = vunpack.c.h.bf16 %v2510_v38 }
 0x1a0   : > { %vm976_vm8 = vcmp.gt.f32.partialorder %v970_v54, 0.0  ;;  %v982_v57 = vmul.f32 0.01, %v970_v54  ;;  %v987_v59 = vsel %vm975_vm5, %v969_v51, %v981_v55  ;;  %v1492_v55 = vld [vmem:[%s3666_s9 + $0x70] sm:$0xff] }
 0x1a1   : > { %v989_v60 = vsel %vm977_vm6, %v971_v52, %v983_v56  ;;  %v990_v2 = vpack.c.bf16 %v987_v59, %v984_v0  ;;  %v1491_v56 = vld [vmem:[%s3666_s9 + $0x68] sm:$0xff]  ;;  %v1488_v59 = vld [vmem:[%s3666_s9 + $0x50] sm:$0xff] }
 0x1a2   : > { %v992_v61 = vpack.c.bf16 %v989_v60, %v986_v58  ;;  %v988_v63 = vsel %vm976_vm8, %v970_v54, %v982_v57  ;;  %v1490_v57 = vld [vmem:[%s3666_s9 + $0x60] sm:$0xff]  ;;  %v1489_v58 = vld [vmem:[%s3666_s9 + $0x58] sm:$0xff]  ;;  %v1487_v60 = vld [vmem:[%s3666_s9 + $0x48] sm:$0xff] }
 0x1a3   : > { %v991_v1 = vpack.c.bf16 %v988_v63, %v985_v62  ;;  %v1485_v62 = vld [vmem:[%s3666_s9 + $0x38] sm:$0xff]  ;;  %v1484_v63 = vld [vmem:[%s3666_s9 + $0x30] sm:$0xff]  ;;  %v1483_v0 = vld [vmem:[%s3666_s9 + $0x28] sm:$0xff] }
 0x1a4   : > { %2669 = vmatmul.mubr.bf16.vlgmr.msra.gmra.mxu1 %v992_v61  ;;  %v1486_v61 = vld [vmem:[%s3666_s9 + $0x40] sm:$0xff] }
 0x1a5   : > { %1224 = vmatprep.mubr.bf16.mxu0 %v991_v1  ;;  %2708 = vmatpush3.msk.msra.mxu1 %vm1399_vm11, %v1391_v47  ;;  %v1482_v1 = vld [vmem:[%s3666_s9 + $0x20] sm:$0xff] }
 0x1a6   : > { %1225 = vmatmul.mubr.bf16.vlgmr.msra.gmra.mxu0 %v990_v2  ;;  %2712 = vmatprep.subr.mxu1 %v1493_v48  ;;  %v1481_v2 = vld [vmem:[%s3666_s9 + $0x18] sm:$0xff] }
 0x1a7   : > { %2673 = vmatpush3.msra.mxu0 %v1311_v3  ;;  %v1480_v3 = vld [vmem:[%s3666_s9 + $0x10] sm:$0xff] }
 0x1a8   : > { %2674 = vmatprep.subr.mxu0 %v1310_v4 }
 0x1a9   : > { %2675 = vmatpush3.msra.mxu0 %v1310_v4  ;;  %v1479_v4 = vld [vmem:[%s3666_s9 + $0x8] sm:$0xff] }
 0x1aa   : > { %2676 = vmatprep.subr.mxu0 %v1309_v5 }
 0x1ab   : > { %2677 = vmatpush3.msra.mxu0 %v1309_v5  ;;  %v1478_v5 = vld [vmem:[%s3666_s9] sm:$0xff] }
 0x1ac   : > { %2678 = vmatprep.subr.mxu0 %v1308_v6 }
 0x1ad   : > { %2679 = vmatpush3.msra.mxu0 %v1308_v6  ;;  %v3491_v6 = vld [vmem:[%s3671_s14 + $0x18] sm:$0xff] }
 0x1ae   : > { %2680 = vmatprep.subr.mxu0 %v1307_v7 }
 0x1af   : > { %2681 = vmatpush3.msra.mxu0 %v1307_v7 }
 0x1b0   : > { %2682 = vmatprep.subr.mxu0 %v1306_v8 }
 0x1b1   : > { %2683 = vmatpush3.msra.mxu0 %v1306_v8  ;;  %v3498_v8 = vld [vmem:[%s3671_s14 + $0x10] sm:$0xff] }
 0x1b2   : > { %2684 = vmatprep.subr.mxu0 %v1305_v9 }
 0x1b3   : > { %2685 = vmatpush3.msra.mxu0 %v1305_v9  ;;  %v3507_v9 = vld [vmem:[%s3671_s14 + $0x8] sm:$0xff] }
 0x1b4   : > { %2686 = vmatprep.subr.mxu0 %v1304_v10 }
 0x1b5   : > { %2687 = vmatpush3.msra.mxu0 %v1304_v10  ;;  %v3514_v10 = vld [vmem:[%s3671_s14] sm:$0xff] }
 0x1b6   : > { %2688 = vmatprep.subr.mxu0 %v1303_v11 }
 0x1b7   : > { %2689 = vmatpush3.msra.mxu0 %v1303_v11 }
 0x1b8   : > { %2690 = vmatprep.subr.mxu0 %v1302_v12 }
 0x1b9   : > { %2691 = vmatpush3.msra.mxu0 %v1302_v12  ;;  %v1583_v12 = vld [vmem:[%s3669_s12 + $0x8] sm:$0xf] }
 0x1ba   : > { %2692 = vmatprep.subr.mxu0 %v1301_v13 }
 0x1bb   : > { %2693 = vmatpush3.msra.mxu0 %v1301_v13  ;;  %v1582_v13 = vld [vmem:[%s3669_s12] sm:$0xff] }
 0x1bc   : > { %2694 = vmatprep.subr.mxu0 %v1300_v14 }
 0x1bd   : > { %2695 = vmatpush3.msra.mxu0 %v1300_v14 }
 0x1be   : > { %2696 = vmatprep.subr.mxu0 %v1299_v15 }
 0x1bf   : > { %2697 = vmatpush3.msra.mxu0 %v1299_v15 }
 0x1c0   : > { %2698 = vmatprep.subr.mxu0 %v1298_v19 }
 0x1c1   : > { %2699 = vmatpush3.msra.mxu0 %v1298_v19 }
 0x1c2   : > { %2700 = vmatprep.subr.mxu0 %v1297_v20 }
 0x1c3   : > { %2701 = vmatpush3.msra.mxu0 %v1297_v20 }
 0x1c4   : > { %2702 = vmatprep.subr.mxu0 %v1296_v27 }
 0x1c5   : > { %2703 = vmatpush3.msra.mxu0 %v1296_v27 }
 0x1c6   : > { %2747 = vmatprep.subr.msk.mxu0 %vm1399_vm11, %v1583_v12 }
 0x264   : > { %v1267_v17 = vpop.f32.mrf.mxu1 }
 0x266   : > { %v2670_v16 = vpop.f32.mrf.mxu1  ;;  %v2543_v18 = vpop.f32.mrf.mxu0 }
 0x268   : > { %v1270_v21 = vpop.f32.mrf.mxu1  ;;  %v2544_v23 = vpop.f32.mrf.mxu0 }
 0x269   : > { %v2545_v24 = vadd.f32 %v2544_v23, %v2543_v18  ;;  %v2472_v18 = vld [vmem:[%s3668_s11] ss:$0 sm:$0xff] }
 0x26a   : > { %v2671_v25 = vpop.f32.mrf.mxu1  ;;  %v2546_v26 = vpop.f32.mrf.mxu0 }
 0x26b   : > { %v1227_v28 = vadd.f32 %v2545_v24, %v2444_v22 }
 0x26c   : > { %v2547_v29 = vpop.f32.mrf.mxu0 }
 0x26d   : > { %v1268_v30 = vadd.f32 %v1267_v17, %v1227_v28  ;;  %v2548_v31 = vadd.f32 %v2547_v29, %v2546_v26  ;;  %v2852_v29 = vpack.i.bf16 %v3425_v43, %v3421_v39 }
 0x26f   : > { %v1230_v32 = vadd.f32 %v2548_v31, %v2444_v22  ;;  %vm1274_vm9 = vcmp.gt.f32.partialorder %v1268_v30, 0.0  ;;  %v1276_v33 = vmul.f32 0.01, %v1268_v30  ;;  %v1681_v31 = vld [vmem:[%s3670_s13] sm:$0xff] }
 0x271   : > { %v1271_v34 = vadd.f32 %v1270_v21, %v1230_v32  ;;  %v3409_v35 = vsel %vm1274_vm9, %v1268_v30, %v1276_v33  ;;  %v1682_v30 = vld [vmem:[%s3670_s13 + $0x8] sm:$0xf] }
 0x272   : > { %1286 = vrot.lane.b32.xlu0 %v3409_v35, %s3678_s30  ;;  %v1867_v7 = vmul.f32 %v3421_v39, %v3409_v35 }
 0x273   : > { %vm1275_vm10 = vcmp.gt.f32.partialorder %v1271_v34, 0.0  ;;  %v1277_v36 = vmul.f32 0.01, %v1271_v34 }
 0x275   : > { %v3413_v37 = vsel %vm1275_vm10, %v1271_v34, %v1277_v36 }
 0x276   : > { %1288 = vrot.lane.b32.xlu1 %v3413_v37, %s3678_s30  ;;  %v1868_v11 = vmul.f32 %v3425_v43, %v3413_v37 }
 0x2e4   : > { %v1287_v40 = vpop.permute.xlu0 %1286 }
 0x2e5   : > { %v1292_v41 = vsel %vm605_vm1, %v3421_v39, %v1287_v40 }
 0x2e6   : > { %v1294_v42 = vmul.f32 %v1292_v41, %v1292_v41 }
 0x2e8   : > { %v1289_v44 = vpop.permute.xlu1 %1288  ;;  %2704 = vmatprep.mubr.f32.mxu0 %v1294_v42 }
 0x2e9   : > { %v3429_v45 = vsel %vm605_vm1, %v3425_v43, %v1289_v44 }
 0x2ea   : > { %v1295_v46 = vmul.f32 %v3429_v45, %v3429_v45 }
 0x2ec   : > { %2705 = vmatmul.mubr.f32.vlgmr.msra.gmra.mxu0 %v1295_v46 }
 0x2ed   : > { %2748 = vmatpush3.msk.msra.mxu0 %vm1399_vm11, %v1583_v12 }
 0x2ee   : > { %2749 = vmatprep.subr.mxu0 %v1582_v13 }
 0x2ef   : > { %2750 = vmatpush3.msra.mxu0 %v1582_v13 }
 0x2f0   : > { %2754 = vmatprep.subr.msk.mxu0 %vm1399_vm11, %v1682_v30 }
 0x3ac   : > { %v2706_v49 = vpop.f32.mrf.mxu0 }
 0x3ad   : > { %v1388_v50 = vmax.f32 %v2706_v49, 1e-24 }
 0x3ae   : > { %v1378_v51 = vpop.f32.mrf.mxu0 }
 0x3af   : > { %v1387_v52 = vmax.f32 %v1378_v51, 1e-24 }
 0x3b1   : > { %2922 = vrsqrt.f32 %v1387_v52  ;;  %v2040_v52 = vld [vmem:[%s3672_s15 + $0x8] sm:$0xf] }
 0x3b2   : > { %2924 = vrsqrt.f32 %v1388_v50 }
 0x3be   : > { %v2923_v53 = vpop.eup %2922 }
 0x3bf   : > { %v2925_v54 = vpop.eup %2924  ;;  %2709 = vmatprep.mubr.msk.f32.mxu1 %vm1392_vm12, %v2923_v53  ;;  %v2039_v53 = vld [vmem:[%s3672_s15] sm:$0xff] }
 0x3c0   : > { %2710 = vmatmul.mubr.msk.f32.vlgmr.msra.gmra.mxu1 %vm1392_vm12, %v2925_v54 }
 0x3c1   : > { %2713 = vmatpush3.msra.mxu1 %v1493_v48  ;;  %2744 = vmatprep.mubr.f32.mxu1 %v1292_v41 }
 0x3c2   : > { %2714 = vmatprep.subr.mxu1 %v1492_v55 }
 0x3c3   : > { %2715 = vmatpush3.msra.mxu1 %v1492_v55 }
 0x3c4   : > { %2716 = vmatprep.subr.mxu1 %v1491_v56 }
 0x3c5   : > { %2717 = vmatpush3.msra.mxu1 %v1491_v56 }
 0x3c6   : > { %2718 = vmatprep.subr.mxu1 %v1490_v57 }
 0x3c7   : > { %2719 = vmatpush3.msra.mxu1 %v1490_v57 }
 0x3c8   : > { %2720 = vmatprep.subr.mxu1 %v1489_v58 }
 0x3c9   : > { %2721 = vmatpush3.msra.mxu1 %v1489_v58 }
 0x3ca   : > { %2722 = vmatprep.subr.mxu1 %v1488_v59 }
 0x3cb   : > { %2723 = vmatpush3.msra.mxu1 %v1488_v59 }
 0x3cc   : > { %2724 = vmatprep.subr.mxu1 %v1487_v60 }
 0x3cd   : > { %2725 = vmatpush3.msra.mxu1 %v1487_v60 }
 0x3ce   : > { %2726 = vmatprep.subr.mxu1 %v1486_v61 }
 0x3cf   : > { %2727 = vmatpush3.msra.mxu1 %v1486_v61 }
 0x3d0   : > { %2728 = vmatprep.subr.mxu1 %v1485_v62 }
 0x3d1   : > { %2729 = vmatpush3.msra.mxu1 %v1485_v62 }
 0x3d2   : > { %2730 = vmatprep.subr.mxu1 %v1484_v63 }
 0x3d3   : > { %2731 = vmatpush3.msra.mxu1 %v1484_v63 }
 0x3d4   : > { %2732 = vmatprep.subr.mxu1 %v1483_v0 }
 0x3d5   : > { %2733 = vmatpush3.msra.mxu1 %v1483_v0 }
 0x3d6   : > { %2734 = vmatprep.subr.mxu1 %v1482_v1 }
 0x3d7   : > { %2735 = vmatpush3.msra.mxu1 %v1482_v1 }
 0x3d8   : > { %2736 = vmatprep.subr.mxu1 %v1481_v2 }
 0x3d9   : > { %2737 = vmatpush3.msra.mxu1 %v1481_v2 }
 0x3da   : > { %2738 = vmatprep.subr.mxu1 %v1480_v3 }
 0x3db   : > { %2739 = vmatpush3.msra.mxu1 %v1480_v3 }
 0x3dc   : > { %2740 = vmatprep.subr.mxu1 %v1479_v4 }
 0x3dd   : > { %2741 = vmatpush3.msra.mxu1 %v1479_v4 }
 0x3de   : > { %2742 = vmatprep.subr.mxu1 %v1478_v5 }
 0x3df   : > { %2743 = vmatpush3.msra.mxu1 %v1478_v5 }
 0x3e0   : > { %2745 = vmatmul.mubr.f32.vlgmr.msra.gmra.mxu1 %v3429_v45  ;;  %2772 = vmatprep.subr.mxu1 %v3491_v6 }
 0x3e1   : > { %2773 = vmatpush3.msra.mxu1 %v3491_v6  ;;  %2780 = vmatprep.mubr.msk.f32.mxu1 %vm1785_vm13, %v1867_v7 }
 0x3e2   : > { %2774 = vmatprep.subr.mxu1 %v3498_v8 }
 0x3e3   : > { %2775 = vmatpush3.msra.mxu1 %v3498_v8 }
 0x3e4   : > { %2776 = vmatprep.subr.mxu1 %v3507_v9 }
 0x3e5   : > { %2777 = vmatpush3.msra.mxu1 %v3507_v9 }
 0x3e6   : > { %2778 = vmatprep.subr.mxu1 %v3514_v10 }
 0x3e7   : > { %2779 = vmatpush3.msra.mxu1 %v3514_v10 }
 0x3e8   : > { %2781 = vmatmul.mubr.msk.f32.vlgmr.msra.gmra.mxu1 %vm1785_vm13, %v1868_v11  ;;  %2794 = vmatprep.subr.msk.mxu1 %vm1399_vm11, %v2040_v52 }
 0x3e9   : > { %2795 = vmatpush3.msk.msra.mxu1 %vm1399_vm11, %v2040_v52 }
 0x3ea   : > { %2796 = vmatprep.subr.mxu1 %v2039_v53 }
 0x3eb   : > { %2797 = vmatpush3.msra.mxu1 %v2039_v53 }
 0x480   : > { %v2711_v14 = vpop.f32.mrf.mxu1 }
 0x482   : > { %v1469_v15 = vpop.f32.mrf.mxu1 }
 0x4a0   : > { %v2746_v17 = vpop.f32.mrf.mxu1 }
 0x4a1   : > { %v1570_v16 = vmul.f32 %v2746_v17, %v2711_v14 }
 0x4a2   : > { %v1560_v19 = vpop.f32.mrf.mxu1 }
 0x4a3   : > { %v1569_v20 = vmul.f32 %v1560_v19, %v1469_v15  ;;  %v1579_v21 = vadd.f32 %v2472_v18, %v1570_v16 }
 0x4a5   : > { %v1578_v22 = vadd.f32 %v2472_v18, %v1569_v20 }
 0x4a7   : > { %2926 = vtanh.f32 %v1578_v22 }
 0x4a8   : > { %2928 = vtanh.f32 %v1579_v21 }
 0x4b4   : > { %v2927_v23 = vpop.eup %2926 }
 0x4b5   : > { %v2929_v24 = vpop.eup %2928  ;;  %2751 = vmatprep.mubr.msk.f32.mxu0 %vm1584_vm14, %v2927_v23 }
 0x4b6   : > { %2752 = vmatmul.mubr.msk.f32.vlgmr.msra.gmra.mxu0 %vm1584_vm14, %v2929_v24 }
 0x4b7   : > { %2755 = vmatpush3.msk.msra.mxu0 %vm1399_vm11, %v1682_v30 }
 0x4b8   : > { %2756 = vmatprep.subr.mxu0 %v1681_v31 }
 0x4b9   : > { %2757 = vmatpush3.msra.mxu0 %v1681_v31 }
 0x4ba   : > { %2761 = vmatprep.subr.mxu0 %v3491_v6 }
 0x576   : > { %v2753_v25 = vpop.f32.mrf.mxu0 }
 0x577   : > { %v1672_v26 = vsel %vm1584_vm14, %v2753_v25, -inf }
 0x578   : > { %1673 = vmax.xlane.f32.xlu0 %v1672_v26  ;;  %v1660_v27 = vpop.f32.mrf.mxu0 }
 0x579   : > { %v1669_v28 = vsel %vm1584_vm14, %v1660_v27, -inf }
 0x57a   : > { %1670 = vmax.xlane.f32.xlu1 %v1669_v28 }
 0x58b   : > { %1950 = vrot.lane.b32.xlu1 %v3409_v35, %s3028_s0 }
 0x58e   : > { %2853 = vrot.lane.b32.xlu0 %v2852_v29, %s3028_s0 }
 0x58f   : > { %1952 = vrot.lane.b32.xlu1 %v3413_v37, %s3028_s0 }
 0x601   : > { %v1674_v32 = vpop.xlane.xlu0 %1673 }
 0x602   : > { %v1676_v33 = vsub.f32 %v2753_v25, %v1674_v32 }
 0x603   : > { %v1671_v34 = vpop.xlane.xlu1 %1670 }
 0x604   : > { %v1675_v36 = vsub.f32 %v1660_v27, %v1671_v34  ;;  %v1679_v38 = vmul.f32 1.442695, %v1676_v33 }
 0x605   : > { %v2854_v41 = vpop.permute.xlu0 %2853 }
 0x606   : > { %v1677_v40 = vmul.f32 1.442695, %v1675_v36  ;;  %v2855_v42 = vunpack.i.l.bf16 %v2854_v41  ;;  %v2856_v47 = vunpack.i.h.bf16 %v2854_v41 }
 0x607   : > { %v1951_v48 = vpop.permute.xlu1 %1950 }
 0x608   : > { %2930 = vpow2.f32 %v1677_v40  ;;  %v1783_v44 = vmul.f32 %v2855_v42, %v3421_v39  ;;  %v1784_v49 = vmul.f32 %v2856_v47, %v3425_v43  ;;  %v1956_v50 = vmul.f32 %v3421_v39, %v1951_v48  ;;  %v2203_v48 = vld [vmem:[%s3673_s16] sm:$0xf] }
 0x609   : > { %2932 = vpow2.f32 %v1679_v38  ;;  %2801 = vmatprep.subr.msk.mxu1 %vm1399_vm11, %v2203_v48 }
 0x60b   : > { %v1953_v51 = vpop.permute.xlu1 %1952 }
 0x60c   : > { %v1957_v39 = vmul.f32 %v3425_v43, %v1953_v51  ;;  %v2782_v43 = vpop.f32.mrf.mxu1 }
 0x60d   : > { %v2148_v57 = vand.u32 2147483647, %v2782_v43  ;;  %v2146_v25 = vmax.f32 %v2782_v43, 0.0 }
 0x60e   : > { %v1941_v55 = vpop.f32.mrf.mxu1 }
 0x60f   : > { %v2147_v58 = vand.u32 2147483647, %v1941_v55  ;;  %v2150_v59 = vsub.f32 0.0, %v2148_v57  ;;  %v2145_v30 = vmax.f32 %v1941_v55, 0.0 }
 0x611   : > { %v2149_v60 = vsub.f32 0.0, %v2147_v58  ;;  %v2153_v62 = vmul.f32 1.442695, %v2150_v59 }
 0x613   : > { %v2151_v63 = vmul.f32 1.442695, %v2149_v60 }
 0x615   : > { %v2931_v45 = vpop.eup %2930 }
 0x616   : > { %v2933_v46 = vpop.eup %2932  ;;  %2758 = vmatprep.mubr.msk.f32.mxu0 %vm1584_vm14, %v2931_v45 }
 0x617   : > { %2759 = vmatmul.mubr.msk.f32.vlgmr.msra.gmra.mxu0 %vm1584_vm14, %v2933_v46 }
 0x618   : > { %2762 = vmatpush3.msra.mxu0 %v3491_v6  ;;  %2769 = vmatprep.mubr.msk.f32.mxu0 %vm1785_vm13, %v1783_v44 }
 0x619   : > { %2763 = vmatprep.subr.mxu0 %v3498_v8 }
 0x61a   : > { %2764 = vmatpush3.msra.mxu0 %v3498_v8 }
 0x61b   : > { %2765 = vmatprep.subr.mxu0 %v3507_v9 }
 0x61c   : > { %2766 = vmatpush3.msra.mxu0 %v3507_v9 }
 0x61d   : > { %2767 = vmatprep.subr.mxu0 %v3514_v10 }
 0x61e   : > { %2768 = vmatpush3.msra.mxu0 %v3514_v10 }
 0x61f   : > { %2770 = vmatmul.mubr.msk.f32.vlgmr.msra.gmra.mxu0 %vm1785_vm13, %v1784_v49  ;;  %2783 = vmatprep.subr.mxu0 %v3491_v6 }
 0x620   : > { %2784 = vmatpush3.msra.mxu0 %v3491_v6  ;;  %2791 = vmatprep.mubr.msk.f32.mxu0 %vm1785_vm13, %v1956_v50 }
 0x621   : > { %2785 = vmatprep.subr.mxu0 %v3498_v8 }
 0x622   : > { %2786 = vmatpush3.msra.mxu0 %v3498_v8 }
 0x623   : > { %2787 = vmatprep.subr.mxu0 %v3507_v9 }
 0x624   : > { %2788 = vmatpush3.msra.mxu0 %v3507_v9 }
 0x625   : > { %2789 = vmatprep.subr.mxu0 %v3514_v10 }
 0x626   : > { %2790 = vmatpush3.msra.mxu0 %v3514_v10 }
 0x627   : > { %2792 = vmatmul.mubr.msk.f32.vlgmr.msra.gmra.mxu0 %vm1785_vm13, %v1957_v39 }
 0x6d7   : > { %v2760_v54 = vpop.f32.mrf.mxu0 }
 0x6d8   : > { %2934 = vrcp.f32 %v2760_v54 }
 0x6d9   : > { %v1758_v56 = vpop.f32.mrf.mxu0 }
 0x6da   : > { %2936 = vrcp.f32 %v1758_v56 }
 0x6db   : > { %2938 = vpow2.f32 %v2153_v62 }
 0x6dc   : > { %2940 = vpow2.f32 %v2151_v63 }
 0x6df   : > { %v3584_v61 = vpop.f32.mrf.mxu0 }
 0x6e0   : > { %v2128_v42 = vand.u32 2147483647, %v3584_v61  ;;  %v2126_v50 = vmax.f32 %v3584_v61, 0.0 }
 0x6e1   : > { %v3586_v0 = vpop.f32.mrf.mxu0 }
 0x6e2   : > { %v2130_v44 = vsub.f32 0.0, %v2128_v42  ;;  %v2127_v58 = vand.u32 2147483647, %v3586_v0 }
 0x6e4   : > { %v2129_v59 = vsub.f32 0.0, %v2127_v58 }
 0x6e5   : > { %v2935_v1 = vpop.eup %2934 }
 0x6e6   : > { %v1770_v7 = vmul.f32 %v2935_v1, %v2933_v46  ;;  %v2131_v60 = vmul.f32 1.442695, %v2129_v59  ;;  %v2125_v1 = vmax.f32 %v3586_v0, 0.0 }
 0x6e7   : > { %v2937_v2 = vpop.eup %2936  ;;  %v2793_v3 = vpop.f32.mrf.mxu0 }
 0x6e8   : > { %v2166_v4 = vand.u32 2147483647, %v2793_v3  ;;  %v1768_v5 = vmul.f32 %v2937_v2, %v2931_v45  ;;  %v2939_v13 = vpop.eup %2938  ;;  %v2164_v27 = vmax.f32 %v2793_v3, 0.0  ;;  %v2133_v45 = vmul.f32 1.442695, %v2130_v44 }
 0x6e9   : > { %v2030_v6 = vpop.f32.mrf.mxu0  ;;  %v2941_v14 = vpop.eup %2940  ;;  %v2156_v15 = vadd.f32 1.0, %v2939_v13 }
 0x6ea   : > { %v2168_v8 = vsub.f32 0.0, %v2166_v4  ;;  %v2165_v9 = vand.u32 2147483647, %v2030_v6  ;;  %2798 = vmatprep.mubr.msk.f32.mxu1 %vm1584_vm14, %v1768_v5  ;;  %v2155_v17 = vadd.f32 1.0, %v2941_v14  ;;  %v2163_v33 = vmax.f32 %v2030_v6, 0.0 }
 0x6eb   : > { %2799 = vmatmul.mubr.msk.f32.vlgmr.msra.gmra.mxu1 %vm1584_vm14, %v1770_v7 }
 0x6ec   : > { %v2171_v10 = vmul.f32 1.442695, %v2168_v8  ;;  %v2167_v11 = vsub.f32 0.0, %v2165_v9  ;;  %2802 = vmatpush3.msk.msra.mxu1 %vm1399_vm11, %v2203_v48 }
 0x6ee   : > { %2942 = vpow2.f32 %v2171_v10  ;;  %v2169_v12 = vmul.f32 1.442695, %v2167_v11 }
 0x6f0   : > { %2944 = vpow2.f32 %v2169_v12 }
 0x6f1   : > { %2946 = vlog2.f32 %v2156_v15 }
 0x6f2   : > { %2948 = vlog2.f32 %v2155_v17 }
 0x6fb   : > { %v2943_v16 = vpop.eup %2942 }
 0x6fc   : > { %v2174_v18 = vadd.f32 1.0, %v2943_v16 }
 0x6fd   : > { %v2945_v19 = vpop.eup %2944 }
 0x6fe   : > { %2950 = vlog2.f32 %v2174_v18  ;;  %v2173_v20 = vadd.f32 1.0, %v2945_v19  ;;  %v2947_v21 = vpop.eup %2946 }
 0x6ff   : > { %v2949_v22 = vpop.eup %2948  ;;  %v2160_v23 = vmul.f32 0.6931472, %v2947_v21 }
 0x700   : > { %2952 = vlog2.f32 %v2173_v20  ;;  %v2158_v26 = vmul.f32 0.6931472, %v2949_v22 }
 0x701   : > { %v2162_v31 = vadd.f32 %v2160_v23, %v2146_v25  ;;  %2954 = vpow2.f32 %v2133_v45 }
 0x702   : > { %v2161_v36 = vadd.f32 %v2158_v26, %v2145_v30 }
 0x70b   : > { %v2951_v24 = vpop.eup %2950 }
 0x70c   : > { %v2178_v28 = vmul.f32 0.6931472, %v2951_v24 }
 0x70d   : > { %v2953_v29 = vpop.eup %2952 }
 0x70e   : > { %v2180_v32 = vadd.f32 %v2178_v28, %v2164_v27  ;;  %v2176_v34 = vmul.f32 0.6931472, %v2953_v29  ;;  %v2955_v46 = vpop.eup %2954 }
 0x70f   : > { %v2136_v47 = vadd.f32 1.0, %v2955_v46 }
 0x710   : > { %v2179_v38 = vadd.f32 %v2176_v34, %v2163_v33  ;;  %v2182_v40 = vadd.f32 %v2180_v32, %v2162_v31 }
 0x711   : > { %2956 = vlog2.f32 %v2136_v47 }
 0x712   : > { %2187 = vrot.lane.b32.xlu0 %v2182_v40, %s3679_s26  ;;  %v2181_v41 = vadd.f32 %v2179_v38, %v2161_v36  ;;  %2958 = vpow2.f32 %v2131_v60 }
 0x714   : > { %2185 = vrot.lane.b32.xlu1 %v2181_v41, %s3679_s26 }
 0x71e   : > { %v2957_v49 = vpop.eup %2956 }
 0x71f   : > { %v2140_v51 = vmul.f32 0.6931472, %v2957_v49  ;;  %v2959_v62 = vpop.eup %2958 }
 0x720   : > { %v2135_v63 = vadd.f32 1.0, %v2959_v62 }
 0x721   : > { %v2142_v39 = vadd.f32 %v2140_v51, %v2126_v50 }
 0x722   : > { %2960 = vlog2.f32 %v2135_v63 }
 0x72f   : > { %v2961_v61 = vpop.eup %2960 }
 0x730   : > { %v2138_v2 = vmul.f32 0.6931472, %v2961_v61 }
 0x732   : > { %v2141_v3 = vadd.f32 %v2138_v2, %v2125_v1 }
 0x784   : > { %v2188_v52 = vpop.permute.xlu0 %2187 }
 0x786   : > { %v2186_v55 = vpop.permute.xlu1 %2185 }
 0x7ab   : > { %v2800_v53 = vpop.f32.mrf.mxu1 }
 0x7ac   : > { %v2144_v43 = vmul.f32 %v2800_v53, %v2142_v39  ;;  %v2192_v54 = vmul.f32 %v2800_v53, %v2188_v52 }
 0x7ad   : > { %v2116_v56 = vpop.f32.mrf.mxu1 }
 0x7ae   : > { %v2191_v57 = vmul.f32 %v2186_v55, %v2116_v56  ;;  %2197 = vrot.lane.b32.xlu0 %v2192_v54, %s3030_s22  ;;  %v2143_v4 = vmul.f32 %v2141_v3, %v2116_v56 }
 0x7b0   : > { %2195 = vrot.lane.b32.xlu1 %v2191_v57, %s3030_s22  ;;  %s2962_s22 = scalar_lea.vmem %s3615_s29, 128 }
 0x7b1   : > { %p2963_p11 = scmp.ne.s32.totalorder %s3615_s29, %s2962_s22 }
 0x7b3   : > { %p2964_p12 = pnand %p2963_p11, %p3160_p5 }
 0x7b5   : > { %p2965_p13 = pneg %p2964_p12 }
 0x820   : > { %v2198_v5 = vpop.permute.xlu0 %2197 }
 0x821   : > { %v2202_v8 = vadd.f32 %v2198_v5, %v2144_v43 }
 0x822   : > { %v2196_v6 = vpop.permute.xlu1 %2195 }
 0x823   : > { %v2201_v7 = vadd.f32 %v2196_v6, %v2143_v4 }
 0x825   : > { %2803 = vmatprep.mubr.msk.f32.mxu1 %vm1392_vm12, %v2201_v7 }
 0x826   : > { %2804 = vmatmul.mubr.msk.f32.vlgmr.msra.gmra.mxu1 %vm1392_vm12, %v2202_v8 }
 0x8e6   : > { %v2805_v9 = vpop.f32.mrf.mxu1 }
 0x8e8   : > { %v2279_v10 = vpop.f32.mrf.mxu1 }
 0x8e9   : > { %v2857_v11 = vpack.i.bf16 %v2805_v9, %v2279_v10 }
 0x8eb   : > { %2858 = vrot.lane.b32.xlu1 %v2857_v11, %s3678_s30  ;;  %s2966_s30 = sshll.u32 %s3031_s3, 4  ;;  %s2967_s30 = int_to_ptr.vmem [resolvable:$false] %s2966_s30 }
 0x8ec   : > { %s2968_s26 = scalar_lea.vmem %s2967_s30, 256  ;;  %p2969_p0 = scmp.lt.s32.totalorder %s3615_s29, %s2967_s30 }
 0x8ed   : > { %p2970_p1 = scmp.lt.s32.totalorder %s2968_s26, %s2962_s22 }
 0x8ef   : > { %p2971_p2 = por %p2970_p1, %p2969_p0 }
 0x8f1   : > { %p2972_p3 = pnand %p2971_p2, %p2965_p13 }
 0x95d   : > { %v2859_v0 = vpop.permute.xlu1 %2858 }
 0x95e   : > { %v2861_v12 = vunpack.i.h.bf16 %v2859_v0  ;;  %v2860_v13 = vunpack.i.l.bf16 %v2859_v0 }
 0x960   : > { %v2297_v14 = vsel %vm605_vm1, %v3413_v37, %v2861_v12  ;;  %v2296_v15 = vsel %vm605_vm1, %v3409_v35, %v2860_v13 }
 0x961   : > { %v2516_v17 = vpack.c.bf16 %v2297_v14, %v2296_v15 }
 0x963   : > { %2517 = vst [vmem:[%s574_s23] sm:$0xff] %v2516_v17  }
 0x964   : > { %2975 = shalt.err (!%p2972_p3)
}
 0x965   : > { %s2976_s21 = scalar_lea.hbm %s3613_s19, 128  ;;  %s2980_s18 = scalar_lea.hbm %s3674_s17, 256 }
 0x966   : > { %p2977_p4 = scmp.ne.s32.totalorder %s3613_s19, %s2976_s21  ;;  %p2981_p9 = scmp.lt.s32.totalorder %s3613_s19, %s3674_s17 }
 0x967   : > { %p2982_p10 = scmp.lt.s32.totalorder %s2980_s18, %s2976_s21 }
 0x968   : > { %p2978_p7 = pnand %p2977_p4, %p3160_p5 }
 0x969   : > { %p2983_p11 = por %p2982_p10, %p2981_p9 }
 0x96a   : > { %p2979_p8 = pneg %p2978_p7 }
 0x96c   : > { %p2984_p12 = pnand %p2983_p11, %p2979_p8 }
 0x96e   : > { %2987 = shalt.err (!%p2984_p12)
}
 0x96f   : > { %s3693_s30 = smov 4   ;;  %s3694_s26 = smov 64  }
 0x970   : > { %2806 = dma.vmem_to_hbm [thread:$0]  (%p3160_p5), %s3615_s29, 128, %s3613_s19, %s2309_s28, %s3694_s26, %s3694_s26, %s3693_s30  }
 0x971 PF: > { %p2812_p13 = scmp.ge.s32.totalorder %s3022_s27, 2  ;;  %s2337_s22 = sand.u32 1, %s3010_s24  }
 0x972   : > { %s2338_s21 = scalar_lea.sflag [#allocation3], %s2337_s22 }
 0x973   : > { %p2809_p0 = pnand %p2812_p13, %p3164_p6 }
 0x975   : > { %p2810_p1 = pneg %p2809_p0 }
 0x977   : > { %3005 = dma.done.wait (%p2810_p1), %s2338_s21, 128  }
 0x978   : > { %3007 = vsyncadd (%p2810_p1), %s2338_s21, 4294967168  ;;  %s3695_s27 = sld [smem:[#allocation6_spill]]  ;;  %s3698_s24 = smov %s3014_s25 }
 0x979   : > { %s3696_s1 = sld [smem:[#allocation5_spill]] }
 0x97a   : > { %s3697_s26 = sld [smem:[#allocation7_spill]] }
 0x97e   : > { %p27_p2 = scmp.ge.s32.totalorder %s3695_s27, 4  }
 0x97f   : > { %s3699_s25 = smov %s3696_s1 }
 0x980   :  { %29 = sbr.rel (!%p27_p2) target bundleno = 8 (0x8), region = 129 }
 0x985   :  { %2343 = vsyncpa [#allocation3], 1 }
 0x986   :  { %2345 = vsyncpa [#allocation3 + $0x1], 1 }

</bundles_post_ra>
